<compile_context>
chip_gen: v7x
topology: tpu7x:2x2x1
jax: 0.10.0
libtpu: 0.0.40
codegen_flags: <defaults>
</compile_context>

<pallas_src>
import jax
import jax.numpy as jnp
from jax.experimental import pallas as pl
from jax.experimental.pallas import tpu as pltpu


def _round_up(v, m):
    return ((v + m - 1) // m) * m


def _full_spec(shape):
    # whole-array block (small problem; everything fits in VMEM)
    return pl.BlockSpec(shape, lambda: (0,) * len(shape))


def _is_v5e():
    try:
        kind = jax.devices()[0].device_kind.lower()
        return ("v5e" in kind) or ("v5 lite" in kind) or ("v5litepod" in kind)
    except Exception:
        return False


# ---------------------------------------------------------------------------
# Shared epilogue: global_mean_pool -> lin1 -> ReLU -> (dropout = identity in
# eval) -> lin2 -> log_softmax
# ---------------------------------------------------------------------------
def _epilogue(h, p_ref, invc_ref, w1_ref, b1_ref, w2_ref, b2_ref, o_ref,
              num_classes):
    # exact 0/1 indicator matmul (bf16), 1/|V_g| applied in f32
    pooled = jnp.dot(p_ref[...], h, preferred_element_type=jnp.float32)
    pooled = pooled * invc_ref[...]
    hid = jnp.dot(pooled.astype(jnp.bfloat16), w1_ref[...],
                  preferred_element_type=jnp.float32) + b1_ref[...]
    hid = jnp.maximum(hid, 0.0)
    # TODO(synk): F.dropout(p=0.5) only matters in training mode; eval == identity.
    logits = jnp.dot(hid.astype(jnp.bfloat16), w2_ref[...],
                     preferred_element_type=jnp.float32) + b2_ref[...]
    # mask padded class columns, then numerically-stable log_softmax
    col = jax.lax.broadcasted_iota(jnp.int32, logits.shape, 1)
    logits = jnp.where(col < num_classes, logits, -1e30)
    m = jnp.max(logits, axis=-1, keepdims=True)
    s = logits - m
    lse = jnp.log(jnp.sum(jnp.exp(s), axis=-1, keepdims=True))
    o_ref[...] = (s - lse).astype(o_ref.dtype)


# ---------------------------------------------------------------------------
# Fused kernel: L x (GraphConv + 1/|V_g| scale) -> pool -> MLP -> log_softmax
# ---------------------------------------------------------------------------
def _make_fused_kernel(num_layers, np_pad, d_pad, num_classes, split_k):
    if split_k:
        # v5e path: two accumulated dots, no concat scratch (K=2D fused matmul
        # gives zero MXU benefit on a 128x128 MXU).
        def kernel(a_ref, x_ref, scale_ref, w_all_ref, b_all_ref, p_ref,
                   invc_ref, w1_ref, b1_ref, w2_ref, b2_ref, o_ref):
            a = a_ref[...]
            scale_b = jnp.broadcast_to(scale_ref[...], (np_pad, d_pad))  # hoisted
            h = x_ref[...]
            for l in range(num_layers):          # static unroll over layers
                w = w_all_ref[l]                 # (2D, D) bf16
                agg = jnp.dot(a, h, preferred_element_type=jnp.float32
                              ).astype(jnp.bfloat16)
                out = (jnp.dot(agg, w[0:d_pad, :],
                               preferred_element_type=jnp.float32)
                       + jnp.dot(h, w[d_pad:2 * d_pad, :],
                                 preferred_element_type=jnp.float32))
                # reference scales the WHOLE conv output (bias included)
                out = (out + b_all_ref[l]) * scale_b
                h = out.astype(jnp.bfloat16)
            _epilogue(h, p_ref, invc_ref, w1_ref, b1_ref, w2_ref, b2_ref,
                      o_ref, num_classes)
        return kernel

    # v6e / v7x path: fused K=2D matmul, with the concat buffer's h-half acting
    # as the resident layer activation.
    def kernel(a_ref, x_ref, scale_ref, w_all_ref, b_all_ref, p_ref,
               invc_ref, w1_ref, b1_ref, w2_ref, b2_ref, o_ref, cat_ref):
        a = a_ref[...]
        scale_b = jnp.broadcast_to(scale_ref[...], (np_pad, d_pad))  # hoisted
        # seed the h-half of the concat buffer with the input node features
        cat_ref[:, d_pad:2 * d_pad] = x_ref[...]
        for l in range(num_layers):              # static unroll over layers
            # aggregated neighbor features (sum over sources), f32 acc on MXU
            agg = jnp.dot(a, cat_ref[:, d_pad:2 * d_pad],
                          preferred_element_type=jnp.float32)
            # only the agg half is written before the fused matmul
            cat_ref[:, 0:d_pad] = agg.astype(jnp.bfloat16)
            out = jnp.dot(cat_ref[...], w_all_ref[l],
                          preferred_element_type=jnp.float32)
            # reference scales the WHOLE conv output (bias included) by 1/|V_g|
            out = (out + b_all_ref[l]) * scale_b
            # this slice IS the next layer's h
            cat_ref[:, d_pad:2 * d_pad] = out.astype(jnp.bfloat16)
        h = cat_ref[:, d_pad:2 * d_pad]
        _epilogue(h, p_ref, invc_ref, w1_ref, b1_ref, w2_ref, b2_ref,
                  o_ref, num_classes)
    return kernel


# ---------------------------------------------------------------------------
# Parameter init (deterministic, synthetic)
# ---------------------------------------------------------------------------
def init_params(key, num_features, hidden, num_classes, num_layers):
    def lin(key, fin, fout, bias=True):
        kw, kb = jax.random.split(key)
        w = jax.random.normal(kw, (fin, fout), jnp.float32) * 0.1
        b = (jax.random.normal(kb, (1, fout), jnp.float32) * 0.1
             if bias else jnp.zeros((1, fout), jnp.float32))
        return w, b

    keys = jax.random.split(key, 2 * num_layers + 2)
    params = {}
    # conv1: GraphConv(num_features, hidden) -> lin_rel (bias) + lin_root (no bias)
    w_rel, b_rel = lin(keys[0], num_features, hidden, bias=True)
    w_root, _ = lin(keys[1], num_features, hidden, bias=False)
    params["conv1"] = {"w_rel": w_rel, "w_root": w_root, "b": b_rel}
    params["convs"] = []
    for i in range(num_layers - 1):
        w_rel, b_rel = lin(keys[2 + 2 * i], hidden, hidden, bias=True)
        w_root, _ = lin(keys[3 + 2 * i], hidden, hidden, bias=False)
        params["convs"].append({"w_rel": w_rel, "w_root": w_root, "b": b_rel})
    w1, b1 = lin(keys[-2], hidden, hidden, bias=True)
    w2, b2 = lin(keys[-1], hidden, num_classes, bias=True)
    params["lin1"] = {"w": w1, "b": b1}
    params["lin2"] = {"w": w2, "b": b2}
    return params


# ---------------------------------------------------------------------------
# Full forward: plain-JAX glue (densify edge_index / batch, zero-pad to
# lane/sublane-dense shapes) + one fused pallas_call
# ---------------------------------------------------------------------------
def gc_meanpool_forward(params, x, edge_index, batch, num_graphs):
    n, f = x.shape
    hidden = params["lin1"]["w"].shape[0]
    num_classes = params["lin2"]["w"].shape[1]
    layers = [params["conv1"]] + list(params["convs"])
    num_layers = len(layers)

    d = _round_up(max(f, hidden), 128)      # lane-dense feature/hidden dim
    c = _round_up(num_classes, 128)         # lane-dense class dim
    np_ = _round_up(n, 128)                 # whole-MXU-pass contraction dim for A@h
    g = _round_up(num_graphs, 8)            # full-sublane graph axis

    src, dst = edge_index[0], edge_index[1]

    # Dense adjacency A[dst, src] = edge multiplicity (GraphConv "add" aggregation).
    a = (jnp.zeros((np_, np_), jnp.float32).at[dst, src].add(1.0)
         .astype(jnp.bfloat16))
    counts = jnp.zeros((num_graphs,), jnp.float32).at[batch].add(1.0)   # |V_g|
    inv = 1.0 / counts
    scale = jnp.zeros((np_, 1), jnp.float32).at[:n, 0].set(inv[batch])  # 0 on pad rows
    p = (jnp.zeros((g, np_), jnp.float32).at[batch, jnp.arange(n)].set(1.0)
         .astype(jnp.bfloat16))                                         # 0/1 indicator, bf16
    inv_cnt = jnp.zeros((g, 1), jnp.float32).at[:num_graphs, 0].set(inv)

    xp = jnp.zeros((np_, d), jnp.bfloat16).at[:n, :f].set(x.astype(jnp.bfloat16))

    def pad2(w, rows, cols):
        return jnp.zeros((rows, cols), jnp.float32).at[:w.shape[0], :w.shape[1]].set(w)

    # Stacked per-layer weights: rows [0:d] act on A@h (lin_rel), rows [d:2d] on h (lin_root).
    w_all = jnp.stack([
        jnp.concatenate([pad2(l["w_rel"], d, d), pad2(l["w_root"], d, d)], axis=0)
        for l in layers]).astype(jnp.bfloat16)                          # (L, 2d, d)
    b_all = jnp.stack([pad2(l["b"], 1, d) for l in layers])             # (L, 1, d) f32
    w1 = pad2(params["lin1"]["w"], d, d).astype(jnp.bfloat16)
    b1 = jnp.broadcast_to(pad2(params["lin1"]["b"], 1, d), (g, d))      # pre-broadcast
    w2 = pad2(params["lin2"]["w"], d, c).astype(jnp.bfloat16)
    b2 = jnp.broadcast_to(pad2(params["lin2"]["b"], 1, c), (g, c))

    operands = (a, xp, scale, w_all, b_all, p, inv_cnt, w1, b1, w2, b2)

    split_k = _is_v5e()
    scratch_shapes = [] if split_k else [pltpu.VMEM((np_, 2 * d), jnp.bfloat16)]

    flops = (2 * num_layers * (np_ * np_ * d + np_ * 2 * d * d)
             + 2 * (g * np_ * d + g * d * d + g * d * c))
    bytes_accessed = sum(int(op.size) * op.dtype.itemsize for op in operands) + g * c * 4
    cost = pl.CostEstimate(flops=flops, transcendentals=g * c,
                           bytes_accessed=bytes_accessed)

    out = pl.pallas_call(
        _make_fused_kernel(num_layers, np_, d, num_classes, split_k),
        out_shape=jax.ShapeDtypeStruct((g, c), jnp.float32),
        in_specs=[_full_spec(op.shape) for op in operands],
        out_specs=_full_spec((g, c)),
        scratch_shapes=scratch_shapes,
        cost_estimate=cost,
    )(*operands)
    return out[:num_graphs, :num_classes]


if __name__ == "__main__":
    # Small synthetic graph batch consistent with the module's forward.
    num_features, hidden, num_classes, num_layers = 16, 32, 4, 3
    num_nodes, num_graphs, num_edges = 24, 2, 64

    key = jax.random.PRNGKey(0)
    kx, ke, kp = jax.random.split(key, 3)

    x = jax.random.normal(kx, (num_nodes, num_features), jnp.float32)
    edge_index = jax.random.randint(ke, (2, num_edges), 0, num_nodes, jnp.int32)
    batch = jnp.concatenate([
        jnp.zeros((num_nodes // 2,), jnp.int32),
        jnp.ones((num_nodes - num_nodes // 2,), jnp.int32),
    ])  # two graphs of 12 nodes each

    params = init_params(kp, num_features, hidden, num_classes, num_layers)

    fwd = jax.jit(gc_meanpool_forward, static_argnames=("num_graphs",))
    out = fwd(params, x, edge_index, batch, num_graphs=num_graphs)
    out = jax.block_until_ready(out)
    assert out.shape == (num_graphs, num_classes)
    assert bool(jnp.all(jnp.isfinite(out)))
    # each row of log_softmax should (approximately) sum to 1 when exp'd
    assert bool(jnp.all(jnp.abs(jnp.sum(jnp.exp(out), axis=-1) - 1.0) < 1e-3))
    print("KERNEL_OK")
</pallas_src>

<mosaic_0001>
module attributes {stable_mosaic.version = 11 : i64} {
  func.func private @main(%arg0: i32) attributes {dimension_semantics = [#tpu.dimension_semantics<core_parallel>], iteration_bounds = array<i64: 2>, tpu.core_type = #tpu.core_type<sc_scalar_subcore>, window_params = []} {
    return
  }
}

module attributes {stable_mosaic.version = 11 : i64} {
  func.func private @main(%arg0: i32) attributes {dimension_semantics = [#tpu.dimension_semantics<core_parallel>], iteration_bounds = array<i64: 2>, tpu.core_type = #tpu.core_type<sc_scalar_subcore>, window_params = []} {
    return
  }
}

module attributes {stable_mosaic.version = 11 : i64} {
  func.func @kernel(%arg0: memref<128x128xbf16, #tpu.memory_space<vmem>>, %arg1: memref<128x128xbf16, #tpu.memory_space<vmem>>, %arg2: memref<128x1xf32, #tpu.memory_space<vmem>>, %arg3: memref<3x256x128xbf16, #tpu.memory_space<vmem>>, %arg4: memref<3x1x128xf32, #tpu.memory_space<vmem>>, %arg5: memref<8x128xbf16, #tpu.memory_space<vmem>>, %arg6: memref<8x1xf32, #tpu.memory_space<vmem>>, %arg7: memref<128x128xbf16, #tpu.memory_space<vmem>>, %arg8: memref<8x128xf32, #tpu.memory_space<vmem>>, %arg9: memref<128x128xbf16, #tpu.memory_space<vmem>>, %arg10: memref<8x128xf32, #tpu.memory_space<vmem>>, %arg11: memref<8x128xf32, #tpu.memory_space<vmem>>, %arg12: memref<128x256xbf16, #tpu.memory_space<vmem>>) attributes {dimension_semantics = [], scalar_prefetch = 0 : i64, scratch_operands = 1 : i64, tpu.core_type = #tpu.core_type<tc>} {
    %c0 = arith.constant 0 : index
    %c0_0 = arith.constant 0 : index
    %0 = vector.load %arg0[%c0, %c0_0] : memref<128x128xbf16, #tpu.memory_space<vmem>>, vector<128x128xbf16>
    %c0_1 = arith.constant 0 : index
    %c0_2 = arith.constant 0 : index
    %1 = vector.load %arg2[%c0_1, %c0_2] : memref<128x1xf32, #tpu.memory_space<vmem>>, vector<128x1xf32>
    %2 = vector.shape_cast %1 : vector<128x1xf32> to vector<128x1xf32>
    %3 = vector.broadcast %2 : vector<128x1xf32> to vector<128x128xf32>
    %c0_3 = arith.constant 0 : index
    %c0_4 = arith.constant 0 : index
    %4 = vector.load %arg1[%c0_3, %c0_4] : memref<128x128xbf16, #tpu.memory_space<vmem>>, vector<128x128xbf16>
    %c0_5 = arith.constant 0 : index
    %c128 = arith.constant 128 : index
    %5 = vector.load %arg12[%c0_5, %c128] : memref<128x256xbf16, #tpu.memory_space<vmem>>, vector<128x128xbf16>
    tpu.vector_store %arg12[%c0_5, %c128], %4 {strides = array<i32>} : memref<128x256xbf16, #tpu.memory_space<vmem>>, vector<128x128xbf16>,
    %c0_6 = arith.constant 0 : index
    %c128_7 = arith.constant 128 : index
    %6 = vector.load %arg12[%c0_6, %c128_7] : memref<128x256xbf16, #tpu.memory_space<vmem>>, vector<128x128xbf16>
    %cst = arith.constant dense<0.000000e+00> : vector<128x128xf32>
    %7 = tpu.matmul %0, %6, %cst {dimension_numbers = #tpu.dot_dimension_numbers<[1], [0], [0], [1], [0, 0, 1, 1], [], []>} : vector<128x128xbf16>, vector<128x128xbf16>, vector<128x128xf32> -> vector<128x128xf32>
    %8 = arith.truncf %7 : vector<128x128xf32> to vector<128x128xbf16>
    %c0_8 = arith.constant 0 : index
    %c0_9 = arith.constant 0 : index
    %9 = vector.load %arg12[%c0_8, %c0_9] : memref<128x256xbf16, #tpu.memory_space<vmem>>, vector<128x128xbf16>
    tpu.vector_store %arg12[%c0_8, %c0_9], %8 {strides = array<i32>} : memref<128x256xbf16, #tpu.memory_space<vmem>>, vector<128x128xbf16>,
    %c0_10 = arith.constant 0 : index
    %c0_11 = arith.constant 0 : index
    %10 = vector.load %arg12[%c0_10, %c0_11] : memref<128x256xbf16, #tpu.memory_space<vmem>>, vector<128x256xbf16>
    %c0_12 = arith.constant 0 : index
    %c0_13 = arith.constant 0 : index
    %c0_14 = arith.constant 0 : index
    %11 = vector.load %arg3[%c0_12, %c0_13, %c0_14] : memref<3x256x128xbf16, #tpu.memory_space<vmem>>, vector<1x256x128xbf16>
    %12 = vector.shape_cast %11 : vector<1x256x128xbf16> to vector<256x128xbf16>
    %cst_15 = arith.constant dense<0.000000e+00> : vector<128x128xf32>
    %13 = tpu.matmul %10, %12, %cst_15 {dimension_numbers = #tpu.dot_dimension_numbers<[1], [0], [0], [1], [0, 0, 1, 1], [], []>} : vector<128x256xbf16>, vector<256x128xbf16>, vector<128x128xf32> -> vector<128x128xf32>
    %c0_16 = arith.constant 0 : index
    %c0_17 = arith.constant 0 : index
    %c0_18 = arith.constant 0 : index
    %14 = vector.load %arg4[%c0_16, %c0_17, %c0_18] : memref<3x1x128xf32, #tpu.memory_space<vmem>>, vector<1x1x128xf32>
    %15 = vector.shape_cast %14 : vector<1x1x128xf32> to vector<1x128xf32>
    %16 = vector.broadcast %15 : vector<1x128xf32> to vector<128x128xf32>
    %17 = arith.addf %13, %16 : vector<128x128xf32>
    %18 = arith.mulf %17, %3 : vector<128x128xf32>
    %19 = arith.truncf %18 : vector<128x128xf32> to vector<128x128xbf16>
    %c0_19 = arith.constant 0 : index
    %c128_20 = arith.constant 128 : index
    %20 = vector.load %arg12[%c0_19, %c128_20] : memref<128x256xbf16, #tpu.memory_space<vmem>>, vector<128x128xbf16>
    tpu.vector_store %arg12[%c0_19, %c128_20], %19 {strides = array<i32>} : memref<128x256xbf16, #tpu.memory_space<vmem>>, vector<128x128xbf16>,
    %c0_21 = arith.constant 0 : index
    %c128_22 = arith.constant 128 : index
    %21 = vector.load %arg12[%c0_21, %c128_22] : memref<128x256xbf16, #tpu.memory_space<vmem>>, vector<128x128xbf16>
    %cst_23 = arith.constant dense<0.000000e+00> : vector<128x128xf32>
    %22 = tpu.matmul %0, %21, %cst_23 {dimension_numbers = #tpu.dot_dimension_numbers<[1], [0], [0], [1], [0, 0, 1, 1], [], []>} : vector<128x128xbf16>, vector<128x128xbf16>, vector<128x128xf32> -> vector<128x128xf32>
    %23 = arith.truncf %22 : vector<128x128xf32> to vector<128x128xbf16>
    %c0_24 = arith.constant 0 : index
    %c0_25 = arith.constant 0 : index
    %24 = vector.load %arg12[%c0_24, %c0_25] : memref<128x256xbf16, #tpu.memory_space<vmem>>, vector<128x128xbf16>
    tpu.vector_store %arg12[%c0_24, %c0_25], %23 {strides = array<i32>} : memref<128x256xbf16, #tpu.memory_space<vmem>>, vector<128x128xbf16>,
    %c0_26 = arith.constant 0 : index
    %c0_27 = arith.constant 0 : index
    %25 = vector.load %arg12[%c0_26, %c0_27] : memref<128x256xbf16, #tpu.memory_space<vmem>>, vector<128x256xbf16>
    %c1 = arith.constant 1 : index
    %c0_28 = arith.constant 0 : index
    %c0_29 = arith.constant 0 : index
    %26 = vector.load %arg3[%c1, %c0_28, %c0_29] : memref<3x256x128xbf16, #tpu.memory_space<vmem>>, vector<1x256x128xbf16>
    %27 = vector.shape_cast %26 : vector<1x256x128xbf16> to vector<256x128xbf16>
    %cst_30 = arith.constant dense<0.000000e+00> : vector<128x128xf32>
    %28 = tpu.matmul %25, %27, %cst_30 {dimension_numbers = #tpu.dot_dimension_numbers<[1], [0], [0], [1], [0, 0, 1, 1], [], []>} : vector<128x256xbf16>, vector<256x128xbf16>, vector<128x128xf32> -> vector<128x128xf32>
    %c1_31 = arith.constant 1 : index
    %c0_32 = arith.constant 0 : index
    %c0_33 = arith.constant 0 : index
    %29 = vector.load %arg4[%c1_31, %c0_32, %c0_33] : memref<3x1x128xf32, #tpu.memory_space<vmem>>, vector<1x1x128xf32>
    %30 = vector.shape_cast %29 : vector<1x1x128xf32> to vector<1x128xf32>
    %31 = vector.broadcast %30 : vector<1x128xf32> to vector<128x128xf32>
    %32 = arith.addf %28, %31 : vector<128x128xf32>
    %33 = arith.mulf %32, %3 : vector<128x128xf32>
    %34 = arith.truncf %33 : vector<128x128xf32> to vector<128x128xbf16>
    %c0_34 = arith.constant 0 : index
    %c128_35 = arith.constant 128 : index
    %35 = vector.load %arg12[%c0_34, %c128_35] : memref<128x256xbf16, #tpu.memory_space<vmem>>, vector<128x128xbf16>
    tpu.vector_store %arg12[%c0_34, %c128_35], %34 {strides = array<i32>} : memref<128x256xbf16, #tpu.memory_space<vmem>>, vector<128x128xbf16>,
    %c0_36 = arith.constant 0 : index
    %c128_37 = arith.constant 128 : index
    %36 = vector.load %arg12[%c0_36, %c128_37] : memref<128x256xbf16, #tpu.memory_space<vmem>>, vector<128x128xbf16>
    %cst_38 = arith.constant dense<0.000000e+00> : vector<128x128xf32>
    %37 = tpu.matmul %0, %36, %cst_38 {dimension_numbers = #tpu.dot_dimension_numbers<[1], [0], [0], [1], [0, 0, 1, 1], [], []>} : vector<128x128xbf16>, vector<128x128xbf16>, vector<128x128xf32> -> vector<128x128xf32>
    %38 = arith.truncf %37 : vector<128x128xf32> to vector<128x128xbf16>
    %c0_39 = arith.constant 0 : index
    %c0_40 = arith.constant 0 : index
    %39 = vector.load %arg12[%c0_39, %c0_40] : memref<128x256xbf16, #tpu.memory_space<vmem>>, vector<128x128xbf16>
    tpu.vector_store %arg12[%c0_39, %c0_40], %38 {strides = array<i32>} : memref<128x256xbf16, #tpu.memory_space<vmem>>, vector<128x128xbf16>,
    %c0_41 = arith.constant 0 : index
    %c0_42 = arith.constant 0 : index
    %40 = vector.load %arg12[%c0_41, %c0_42] : memref<128x256xbf16, #tpu.memory_space<vmem>>, vector<128x256xbf16>
    %c2 = arith.constant 2 : index
    %c0_43 = arith.constant 0 : index
    %c0_44 = arith.constant 0 : index
    %41 = vector.load %arg3[%c2, %c0_43, %c0_44] : memref<3x256x128xbf16, #tpu.memory_space<vmem>>, vector<1x256x128xbf16>
    %42 = vector.shape_cast %41 : vector<1x256x128xbf16> to vector<256x128xbf16>
    %cst_45 = arith.constant dense<0.000000e+00> : vector<128x128xf32>
    %43 = tpu.matmul %40, %42, %cst_45 {dimension_numbers = #tpu.dot_dimension_numbers<[1], [0], [0], [1], [0, 0, 1, 1], [], []>} : vector<128x256xbf16>, vector<256x128xbf16>, vector<128x128xf32> -> vector<128x128xf32>
    %c2_46 = arith.constant 2 : index
    %c0_47 = arith.constant 0 : index
    %c0_48 = arith.constant 0 : index
    %44 = vector.load %arg4[%c2_46, %c0_47, %c0_48] : memref<3x1x128xf32, #tpu.memory_space<vmem>>, vector<1x1x128xf32>
    %45 = vector.shape_cast %44 : vector<1x1x128xf32> to vector<1x128xf32>
    %46 = vector.broadcast %45 : vector<1x128xf32> to vector<128x128xf32>
    %47 = arith.addf %43, %46 : vector<128x128xf32>
    %48 = arith.mulf %47, %3 : vector<128x128xf32>
    %49 = arith.truncf %48 : vector<128x128xf32> to vector<128x128xbf16>
    %c0_49 = arith.constant 0 : index
    %c128_50 = arith.constant 128 : index
    %50 = vector.load %arg12[%c0_49, %c128_50] : memref<128x256xbf16, #tpu.memory_space<vmem>>, vector<128x128xbf16>
    tpu.vector_store %arg12[%c0_49, %c128_50], %49 {strides = array<i32>} : memref<128x256xbf16, #tpu.memory_space<vmem>>, vector<128x128xbf16>,
    %c0_51 = arith.constant 0 : index
    %c128_52 = arith.constant 128 : index
    %51 = vector.load %arg12[%c0_51, %c128_52] : memref<128x256xbf16, #tpu.memory_space<vmem>>, vector<128x128xbf16>
    %c0_53 = arith.constant 0 : index
    %c0_54 = arith.constant 0 : index
    %52 = vector.load %arg5[%c0_53, %c0_54] : memref<8x128xbf16, #tpu.memory_space<vmem>>, vector<8x128xbf16>
    %cst_55 = arith.constant dense<0.000000e+00> : vector<8x128xf32>
    %53 = tpu.matmul %52, %51, %cst_55 {dimension_numbers = #tpu.dot_dimension_numbers<[1], [0], [0], [1], [0, 0, 1, 1], [], []>} : vector<8x128xbf16>, vector<128x128xbf16>, vector<8x128xf32> -> vector<8x128xf32>
    %c0_56 = arith.constant 0 : index
    %c0_57 = arith.constant 0 : index
    %54 = vector.load %arg6[%c0_56, %c0_57] : memref<8x1xf32, #tpu.memory_space<vmem>>, vector<8x1xf32>
    %55 = vector.broadcast %54 : vector<8x1xf32> to vector<8x128xf32>
    %56 = arith.mulf %53, %55 : vector<8x128xf32>
    %57 = arith.truncf %56 : vector<8x128xf32> to vector<8x128xbf16>
    %c0_58 = arith.constant 0 : index
    %c0_59 = arith.constant 0 : index
    %58 = vector.load %arg7[%c0_58, %c0_59] : memref<128x128xbf16, #tpu.memory_space<vmem>>, vector<128x128xbf16>
    %cst_60 = arith.constant dense<0.000000e+00> : vector<8x128xf32>
    %59 = tpu.matmul %57, %58, %cst_60 {dimension_numbers = #tpu.dot_dimension_numbers<[1], [0], [0], [1], [0, 0, 1, 1], [], []>} : vector<8x128xbf16>, vector<128x128xbf16>, vector<8x128xf32> -> vector<8x128xf32>
    %c0_61 = arith.constant 0 : index
    %c0_62 = arith.constant 0 : index
    %60 = vector.load %arg8[%c0_61, %c0_62] : memref<8x128xf32, #tpu.memory_space<vmem>>, vector<8x128xf32>
    %61 = arith.addf %59, %60 : vector<8x128xf32>
    %cst_63 = arith.constant 0.000000e+00 : f32
    %62 = vector.broadcast %cst_63 : f32 to vector<8x128xf32>
    %63 = arith.maximumf %61, %62 : vector<8x128xf32>
    %64 = arith.truncf %63 : vector<8x128xf32> to vector<8x128xbf16>
    %c0_64 = arith.constant 0 : index
    %c0_65 = arith.constant 0 : index
    %65 = vector.load %arg9[%c0_64, %c0_65] : memref<128x128xbf16, #tpu.memory_space<vmem>>, vector<128x128xbf16>
    %cst_66 = arith.constant dense<0.000000e+00> : vector<8x128xf32>
    %66 = tpu.matmul %64, %65, %cst_66 {dimension_numbers = #tpu.dot_dimension_numbers<[1], [0], [0], [1], [0, 0, 1, 1], [], []>} : vector<8x128xbf16>, vector<128x128xbf16>, vector<8x128xf32> -> vector<8x128xf32>
    %c0_67 = arith.constant 0 : index
    %c0_68 = arith.constant 0 : index
    %67 = vector.load %arg10[%c0_67, %c0_68] : memref<8x128xf32, #tpu.memory_space<vmem>>, vector<8x128xf32>
    %68 = arith.addf %66, %67 : vector<8x128xf32>
    %69 = tpu.iota {dimensions = array<i32: 1>} : vector<8x128xi32>
    %c4_i32 = arith.constant 4 : i32
    %70 = vector.broadcast %c4_i32 : i32 to vector<8x128xi32>
    %71 = arith.cmpi slt, %69, %70 : vector<8x128xi32>
    %cst_69 = arith.constant -1.000000e+30 : f32
    %72 = vector.broadcast %cst_69 : f32 to vector<8x128xf32>
    %73 = arith.select %71, %68, %72 : vector<8x128xi1>, vector<8x128xf32>
    %cst_70 = arith.constant dense<0xFF800000> : vector<8xf32>
    %74 = vector.multi_reduction <maximumf>, %73, %cst_70 [1] : vector<8x128xf32> to vector<8xf32>
    %75 = vector.shape_cast %74 : vector<8xf32> to vector<8x1xf32>
    %76 = vector.broadcast %75 : vector<8x1xf32> to vector<8x128xf32>
    %77 = arith.subf %73, %76 : vector<8x128xf32>
    %78 = math.exp %77 : vector<8x128xf32>
    %cst_71 = arith.constant dense<0.000000e+00> : vector<8xf32>
    %79 = vector.multi_reduction <add>, %78, %cst_71 [1] : vector<8x128xf32> to vector<8xf32>
    %80 = vector.shape_cast %79 : vector<8xf32> to vector<8x1xf32>
    %81 = math.log %80 : vector<8x1xf32>
    %82 = vector.broadcast %81 : vector<8x1xf32> to vector<8x128xf32>
    %83 = arith.subf %77, %82 : vector<8x128xf32>
    %c0_72 = arith.constant 0 : index
    %c0_73 = arith.constant 0 : index
    %84 = vector.load %arg11[%c0_72, %c0_73] : memref<8x128xf32, #tpu.memory_space<vmem>>, vector<8x128xf32>
    tpu.vector_store %arg11[%c0_72, %c0_73], %83 {strides = array<i32>} : memref<8x128xf32, #tpu.memory_space<vmem>>, vector<8x128xf32>,
    return
  }
}

</mosaic_0001>

<bundles_post_ra>
// kernel: gc_meanpool_forward.1
= control target key start
LH: loop header
LB: loop body
LE: loop exit
PB: predicated region body
PF: predicated region fallthrough
CT: control target
= control target key end

     0   :  { %v2427_v32 = vmov 0   ;;  %vm2429_vm0 = vmmov 0   ;;  %s3121_s1 = inlined_call_operand.vmem [shape: bf16[128,128], index: 1, kind: input, shape index: {}]   ;;  %s3122_s0 = inlined_call_operand.vmem [shape: bf16[128,128], index: 0, kind: input, shape index: {}]   ;;  %s3123_s3 = inlined_call_operand.vmem [shape: bf16[3,256,128], index: 3, kind: input, shape index: {}]   ;;  %s3124_s2 = inlined_call_operand.vmem [shape: f32[128,1], index: 2, kind: input, shape index: {}]   ;;  %s3125_s6 = inlined_call_operand.vmem [shape: f32[8,1], index: 6, kind: input, shape index: {}]   ;;  %s3126_s4 = inlined_call_operand.vmem [shape: f32[3,1,128], index: 4, kind: input, shape index: {}]   ;;  %s3127_s7 = inlined_call_operand.vmem [shape: bf16[128,128], index: 7, kind: input, shape index: {}]   ;;  %s3128_s5 = inlined_call_operand.vmem [shape: bf16[8,128], index: 5, kind: input, shape index: {}]   ;;  %s3129_s9 = inlined_call_operand.vmem [shape: bf16[128,128], index: 9, kind: input, shape index: {}]   ;;  %s3130_s8 = inlined_call_operand.vmem [shape: f32[8,128], index: 8, kind: input, shape index: {}]   ;;  %s3131_s10 = inlined_call_operand.vmem [shape: f32[8,128], index: 10, kind: input, shape index: {}]   ;;  %s3132_s11 = inlined_call_operand.vmem [shape: f32[8,128], index: 11, kind: output, shape index: {}]  }
   0x1   :  { %v2343_v0 = vld [vmem:[%s3121_s1] sm:$0xff]   ;;  %v2496_v1 = vld [vmem:[%s3121_s1 + $0x8] sm:$0xff]   ;;  %v2502_v2 = vld [vmem:[%s3121_s1 + $0x10] sm:$0xff]   ;;  %2341 = vset.pattern.permute.xlu0 %v2427_v32  ;;  %2342 = vset.pattern.permute.xlu1 %v2427_v32 }
   0x2   :  { %2182 = vmatprep.subr.bf16.mxu0 %v2343_v0  ;;  %575 = vmatprep.mubr.bf16.mxu1 %v2343_v0  ;;  %v2508_v3 = vld [vmem:[%s3121_s1 + $0x18] sm:$0xff]   ;;  %v2514_v4 = vld [vmem:[%s3122_s0] sm:$0xff]   ;;  %v2528_v6 = vld [vmem:[%s3121_s1 + $0x28] sm:$0xff]  }
   0x3   :  { %2183 = vmatpush3.bf16.msra.mxu0 %v2343_v0  ;;  %2198 = vmatprep.mubr.bf16.mxu0 %v2514_v4  ;;  %v2522_v5 = vld [vmem:[%s3121_s1 + $0x20] sm:$0xff]   ;;  %v2540_v9 = vld [vmem:[%s3121_s1 + $0x30] sm:$0xff]   ;;  %v2361_v10 = vld [vmem:[%s3123_s3 + $0x48] sm:$0xff]  }
   0x4   :  { %2184 = vmatprep.subr.bf16.mxu0 %v2496_v1  ;;  %v2359_v7 = vld [vmem:[%s3123_s3 + $0x40] sm:$0xff]   ;;  %v2362_v11 = vld [vmem:[%s3123_s3 + $0x8] sm:$0xff]   ;;  %v2363_v12 = vld [vmem:[%s3123_s3 + $0x50] sm:$0xff]  }
   0x5   :  { %v2360_v8 = vld [vmem:[%s3123_s3] sm:$0xff]   ;;  %1931 = vmatprep.subr.bf16.mxu1 %v2359_v7  ;;  %v2556_v13 = vld [vmem:[%s3121_s1 + $0x38] sm:$0xff]   ;;  %v2364_v14 = vld [vmem:[%s3123_s3 + $0x10] sm:$0xff]  }
   0x6   :  { %1932 = vmatpush3.bf16.msra.mxu1 %v2360_v8  ;;  %v2365_v15 = vld [vmem:[%s3123_s3 + $0x58] sm:$0xff]   ;;  %v2574_v17 = vld [vmem:[%s3122_s0 + $0x8] sm:$0xff]   ;;  %v2367_v18 = vld [vmem:[%s3123_s3 + $0x60] sm:$0xff]  }
   0x7   :  { %2185 = vmatpush3.bf16.msra.mxu0 %v2496_v1  ;;  %1933 = vmatprep.subr.bf16.mxu1 %v2361_v10  ;;  %v2366_v16 = vld [vmem:[%s3123_s3 + $0x18] sm:$0xff]   ;;  %v2582_v19 = vld [vmem:[%s3122_s0 + $0x10] sm:$0xff]   ;;  %v2368_v20 = vld [vmem:[%s3123_s3 + $0x20] sm:$0xff]  }
   0x8   :  { %2186 = vmatprep.subr.bf16.mxu0 %v2502_v2  ;;  %v2369_v21 = vld [vmem:[%s3123_s3 + $0x68] sm:$0xff]   ;;  %v2371_v23 = vld [vmem:[%s3123_s3 + $0x70] sm:$0xff]   ;;  %v2602_v24 = vld [vmem:[%s3122_s0 + $0x18] sm:$0xff]  }
   0x9   :  { %v2370_v22 = vld [vmem:[%s3123_s3 + $0x28] sm:$0xff]   ;;  %v2607_v25 = vld [vmem:[%s3122_s0 + $0x20] sm:$0xff]   ;;  %v2372_v26 = vld [vmem:[%s3123_s3 + $0x30] sm:$0xff]  }
   0xa   :  { %1934 = vmatpush3.bf16.msra.mxu1 %v2362_v11  ;;  %v2617_v27 = vld [vmem:[%s3122_s0 + $0x28] sm:$0xff]   ;;  %v2622_v28 = vld [vmem:[%s3122_s0 + $0x30] sm:$0xff]   ;;  %v2629_v29 = vld [vmem:[%s3122_s0 + $0x38] sm:$0xff]  }
   0xb   :  { %2187 = vmatpush3.bf16.msra.mxu0 %v2502_v2  ;;  %1935 = vmatprep.subr.bf16.mxu1 %v2363_v12  ;;  %v2373_v30 = vld [vmem:[%s3123_s3 + $0x78] sm:$0xff]   ;;  %v55_v33 = vld [vmem:[%s3124_s2] sm:$0xff]  ;;  %v57_v34 = vld [vmem:[%s3124_s2 + $0x10] sm:$0xff] }
   0xc   :  { %2188 = vmatprep.subr.bf16.mxu0 %v2508_v3  ;;  %v2374_v31 = vld [vmem:[%s3123_s3 + $0x38] sm:$0xff]   ;;  %73 = vperm.xlu0 %2341, %v55_v33   ;;  %v56_v35 = vld [vmem:[%s3124_s2 + $0x8] sm:$0xff]  ;;  %v59_v37 = vld [vmem:[%s3124_s2 + $0x20] sm:$0xff] }
   0xd   :  { %83 = vperm.xlu1 %2342, %v57_v34   ;;  %v58_v36 = vld [vmem:[%s3124_s2 + $0x18] sm:$0xff]  ;;  %v60_v38 = vld [vmem:[%s3124_s2 + $0x28] sm:$0xff]  ;;  %v61_v39 = vld [vmem:[%s3124_s2 + $0x30] sm:$0xff] }
   0xe   :  { %1936 = vmatpush3.bf16.msra.mxu1 %v2364_v14  ;;  %v62_v40 = vld [vmem:[%s3124_s2 + $0x38] sm:$0xff]  ;;  %v63_v41 = vld [vmem:[%s3124_s2 + $0x40] sm:$0xff]  ;;  %v64_v42 = vld [vmem:[%s3124_s2 + $0x48] sm:$0xff] }
   0xf   :  { %2189 = vmatpush3.bf16.msra.mxu0 %v2508_v3  ;;  %1937 = vmatprep.subr.bf16.mxu1 %v2365_v15  ;;  %v65_v43 = vld [vmem:[%s3124_s2 + $0x50] sm:$0xff]  ;;  %v66_v44 = vld [vmem:[%s3124_s2 + $0x58] sm:$0xff]  ;;  %v67_v45 = vld [vmem:[%s3124_s2 + $0x60] sm:$0xff] }
  0x10   :  { %2190 = vmatprep.subr.bf16.mxu0 %v2522_v5  ;;  %78 = vperm.xlu0 %2341, %v56_v35   ;;  %v68_v46 = vld [vmem:[%s3124_s2 + $0x68] sm:$0xff]  ;;  %v69_v47 = vld [vmem:[%s3124_s2 + $0x70] sm:$0xff]  ;;  %v70_v48 = vld [vmem:[%s3124_s2 + $0x78] sm:$0xff] }
  0x11   :  { %88 = vperm.xlu1 %2342, %v58_v36   ;;  %v1527_v49 = vld [vmem:[%s3125_s6] sm:$0xff] }
  0x12   :  { %1938 = vmatpush3.bf16.msra.mxu1 %v2366_v16 }
  0x13   :  { %2191 = vmatpush3.bf16.msra.mxu0 %v2522_v5  ;;  %1939 = vmatprep.subr.bf16.mxu1 %v2367_v18  ;;  %v2703_v18 = vld [vmem:[%s3126_s4] ss:$0 sm:$0xff] }
  0x14   :  { %2192 = vmatprep.subr.bf16.mxu0 %v2528_v6  ;;  %93 = vperm.xlu0 %2341, %v59_v37  }
  0x15   :  { %98 = vperm.xlu1 %2342, %v60_v38  }
  0x16   :  { %1940 = vmatpush3.bf16.msra.mxu1 %v2368_v20 }
  0x17   :  { %2193 = vmatpush3.bf16.msra.mxu0 %v2528_v6  ;;  %1941 = vmatprep.subr.bf16.mxu1 %v2369_v21 }
  0x18   :  { %2194 = vmatprep.subr.bf16.mxu0 %v2540_v9  ;;  %103 = vperm.xlu0 %2341, %v61_v39  }
  0x19   :  { %108 = vperm.xlu1 %2342, %v62_v40  }
  0x1a   :  { %1942 = vmatpush3.bf16.msra.mxu1 %v2370_v22 }
  0x1b   :  { %2195 = vmatpush3.bf16.msra.mxu0 %v2540_v9  ;;  %1943 = vmatprep.subr.bf16.mxu1 %v2371_v23 }
  0x1c   :  { %2196 = vmatprep.subr.bf16.mxu0 %v2556_v13  ;;  %113 = vperm.xlu0 %2341, %v63_v41  }
  0x1d   :  { %118 = vperm.xlu1 %2342, %v64_v42  }
  0x1e   :  { %1944 = vmatpush3.bf16.msra.mxu1 %v2372_v26 }
  0x1f   :  { %2197 = vmatpush3.bf16.msra.mxu0 %v2556_v13  ;;  %1945 = vmatprep.subr.bf16.mxu1 %v2373_v30 }
  0x20   :  { %123 = vperm.xlu0 %2341, %v65_v43  }
  0x21   :  { %128 = vperm.xlu1 %2342, %v66_v44  }
  0x22   :  { %2199 = vmatmul.mubr.bf16.vlgmr.msra.gmra.mrb[0].mxu0 %v2574_v17  ;;  %1946 = vmatpush3.bf16.msra.mxu1 %v2374_v31 }
  0x23   :  { %2202 = vmatprep.mubr.bf16.mxu0 %v2582_v19 }
  0x24   :  { %133 = vperm.xlu0 %2341, %v67_v45  }
  0x25   :  { %138 = vperm.xlu1 %2342, %v68_v46  }
  0x28   :  { %143 = vperm.xlu0 %2341, %v69_v47  }
  0x29   :  { %148 = vperm.xlu1 %2342, %v70_v48  }
  0x2a   :  { %2203 = vmatmul.mubr.bf16.gmra.mrb[4].mxu0 %v2602_v24 }
  0x2b   :  { %2206 = vmatprep.mubr.bf16.mxu0 %v2607_v25 }
  0x2c   :  { %1530 = vperm.xlu0 %2341, %v1527_v49  }
  0x32   :  { %2207 = vmatmul.mubr.bf16.gmra.mrb[8].mxu0 %v2617_v27 }
  0x33   :  { %2210 = vmatprep.mubr.bf16.mxu0 %v2622_v28 }
  0x3a   :  { %2211 = vmatmul.mubr.bf16.gmra.mrb[12].mxu0 %v2629_v29 }
  0x3b   :  { %2230 = vmatprep.mubr.bf16.mxu0 %v2514_v4 }
  0x8c   :  { %v2711_v31 = vpop.permute.xlu1 %83 }
  0x90   :  { %v2719_v40 = vpop.permute.xlu1 %88 }
  0xf5   :  { %v2200_v50 = vpop.f32.mrb[0].mxu0 }
  0xf6   :  { %v313_v51 = vpop.f32.mrb[1].mxu0 }
  0xf7   :  { %v2201_v52 = vpop.f32.mrb[2].mxu0 }
  0xf8   :  { %v377_v53 = vpack.c.bf16 %v2201_v52, %v2200_v50  ;;  %v316_v54 = vpop.f32.mrb[3].mxu0 }
  0xf9   :  { %v376_v55 = vpack.c.bf16 %v316_v54, %v313_v51 }
  0xfb   :  { %576 = vmatmul.mubr.bf16.vlgmr.msra.gmra.mrb[0].mxu1 %v376_v55 }
  0xfc   :  { %583 = vmatprep.mubr.bf16.mxu1 %v2496_v1 }
  0xfd   :  { %v2204_v56 = vpop.f32.mrb[4].mxu0 }
  0xfe   :  { %v329_v57 = vpop.f32.mrb[5].mxu0 }
  0xff   :  { %v2205_v58 = vpop.f32.mrb[6].mxu0 }
 0x100   :  { %v379_v59 = vpack.c.bf16 %v2205_v58, %v2204_v56  ;;  %v332_v60 = vpop.f32.mrb[7].mxu0 }
 0x101   :  { %v378_v61 = vpack.c.bf16 %v332_v60, %v329_v57 }
 0x103   :  { %584 = vmatmul.mubr.bf16.gmra.mrb[4].mxu1 %v377_v53  ;;  %v2731_v53 = vpop.permute.xlu1 %98 }
 0x104   :  { %591 = vmatprep.mubr.bf16.mxu1 %v2502_v2 }
 0x105   :  { %v2208_v62 = vpop.f32.mrb[8].mxu0 }
 0x106   :  { %v345_v63 = vpop.f32.mrb[9].mxu0 }
 0x107   :  { %v2209_v0 = vpop.f32.mrb[10].mxu0 }
 0x108   :  { %v381_v7 = vpack.c.bf16 %v2209_v0, %v2208_v62  ;;  %v348_v8 = vpop.f32.mrb[11].mxu0 }
 0x109   :  { %v380_v10 = vpack.c.bf16 %v348_v8, %v345_v63  ;;  %v2743_v8 = vpop.permute.xlu1 %108 }
 0x10b   :  { %592 = vmatmul.mubr.bf16.gmra.mrb[8].mxu1 %v378_v61 }
 0x10c   :  { %599 = vmatprep.mubr.bf16.mxu1 %v2508_v3  ;;  %v2698_v3 = vpop.permute.xlu0 %73 }
 0x10d   :  { %v2212_v11 = vpop.f32.mrb[12].mxu0 }
 0x10e   :  { %v361_v1 = vpop.f32.mrb[13].mxu0 }
 0x10f   :  { %v2213_v12 = vpop.f32.mrb[14].mxu0 }
 0x110   :  { %v383_v14 = vpack.c.bf16 %v2213_v12, %v2212_v11  ;;  %v364_v15 = vpop.f32.mrb[15].mxu0  ;;  %v2707_v23 = vpop.permute.xlu0 %78 }
 0x111   :  { %v382_v16 = vpack.c.bf16 %v364_v15, %v361_v1 }
 0x113   :  { %600 = vmatmul.mubr.bf16.gmra.mrb[12].mxu1 %v379_v59 }
 0x114   :  { %607 = vmatprep.mubr.bf16.mxu1 %v2522_v5  ;;  %v2729_v52 = vpop.permute.xlu0 %93 }
 0x11b   :  { %608 = vmatmul.mubr.bf16.gmra.mrb[16].mxu1 %v380_v10 }
 0x11c   :  { %615 = vmatprep.mubr.bf16.mxu1 %v2528_v6 }
 0x123   :  { %616 = vmatmul.mubr.bf16.gmra.mrb[20].mxu1 %v381_v7  ;;  %v2741_v7 = vpop.permute.xlu0 %103 }
 0x124   :  { %623 = vmatprep.mubr.bf16.mxu1 %v2540_v9 }
 0x12b   :  { %624 = vmatmul.mubr.bf16.gmra.mrb[24].mxu1 %v382_v16 }
 0x12c   :  { %631 = vmatprep.mubr.bf16.mxu1 %v2556_v13 }
 0x133   :  { %632 = vmatmul.mubr.bf16.gmra.mrb[28].mxu1 %v383_v14 }
 0x134   :  { %2262 = vmatprep.mubr.bf16.mxu1 %v2514_v4 }
 0x1ce   :  { %v1947_v2 = vpop.f32.mrb[0].mxu1 }
 0x1cf   :  { %v1948_v5 = vpop.f32.mrb[1].mxu1 }
 0x1d0   :  { %v1949_v20 = vadd.f32 %v1948_v5, %v1947_v2  ;;  %v1950_v6 = vpop.f32.mrb[2].mxu1 }
 0x1d1   :  { %v1951_v21 = vpop.f32.mrb[3].mxu1 }
 0x1d2   :  { %v578_v9 = vadd.f32 %v1949_v20, %v2703_v18  ;;  %v1952_v22 = vadd.f32 %v1951_v21, %v1950_v6  ;;  %v2753_v21 = vpop.permute.xlu0 %113 }
 0x1d4   :  { %v581_v13 = vadd.f32 %v1952_v22, %v2703_v18  ;;  %v640_v4 = vmul.f32 %v578_v9, %v2698_v3  ;;  %v2755_v9 = vpop.permute.xlu1 %118 }
 0x1d6   :  { %v641_v26 = vmul.f32 %v581_v13, %v2707_v23  ;;  %v1953_v30 = vpop.f32.mrb[4].mxu1 }
 0x1d7   :  { %v1954_v32 = vpop.f32.mrb[5].mxu1 }
 0x1d8   :  { %v1955_v33 = vadd.f32 %v1954_v32, %v1953_v30  ;;  %v1956_v34 = vpop.f32.mrb[6].mxu1  ;;  %v2713_v35 = vpack.c.bf16 %v641_v26, %v640_v4 }
 0x1d9   :  { %v1957_v36 = vpop.f32.mrb[7].mxu1 }
 0x1da   :  { %v586_v37 = vadd.f32 %v1955_v33, %v2703_v18  ;;  %v1958_v38 = vadd.f32 %v1957_v36, %v1956_v34  ;;  %2214 = vmatprep.subr.bf16.mxu0 %v2713_v35 }
 0x1db   :  { %2215 = vmatpush3.bf16.msra.mxu0 %v2713_v35 }
 0x1dc   :  { %v589_v39 = vadd.f32 %v1958_v38, %v2703_v18  ;;  %v642_v41 = vmul.f32 %v586_v37, %v2711_v31 }
 0x1de   :  { %v643_v42 = vmul.f32 %v589_v39, %v2719_v40  ;;  %v1959_v43 = vpop.f32.mrb[8].mxu1  ;;  %v2765_v39 = vpop.permute.xlu0 %123 }
 0x1df   :  { %v1960_v44 = vpop.f32.mrb[9].mxu1 }
 0x1e0   :  { %v1961_v45 = vadd.f32 %v1960_v44, %v1959_v43  ;;  %v1962_v46 = vpop.f32.mrb[10].mxu1  ;;  %v2723_v47 = vpack.c.bf16 %v643_v42, %v642_v41  ;;  %v2767_v41 = vpop.permute.xlu1 %128 }
 0x1e1   :  { %v1963_v48 = vpop.f32.mrb[11].mxu1 }
 0x1e2   :  { %v594_v49 = vadd.f32 %v1961_v45, %v2703_v18  ;;  %v1964_v50 = vadd.f32 %v1963_v48, %v1962_v46  ;;  %2216 = vmatprep.subr.bf16.mxu0 %v2723_v47 }
 0x1e3   :  { %2217 = vmatpush3.bf16.msra.mxu0 %v2723_v47 }
 0x1e4   :  { %v597_v51 = vadd.f32 %v1964_v50, %v2703_v18  ;;  %v644_v54 = vmul.f32 %v594_v49, %v2729_v52 }
 0x1e6   :  { %v645_v55 = vmul.f32 %v597_v51, %v2731_v53  ;;  %v1965_v56 = vpop.f32.mrb[12].mxu1 }
 0x1e7   :  { %v1966_v57 = vpop.f32.mrb[13].mxu1 }
 0x1e8   :  { %v1967_v58 = vadd.f32 %v1966_v57, %v1965_v56  ;;  %v1968_v59 = vpop.f32.mrb[14].mxu1  ;;  %v2735_v60 = vpack.c.bf16 %v645_v55, %v644_v54  ;;  %v2777_v56 = vpop.permute.xlu0 %133 }
 0x1e9   :  { %v1969_v61 = vpop.f32.mrb[15].mxu1  ;;  %v2779_v57 = vpop.permute.xlu1 %138 }
 0x1ea   :  { %v602_v62 = vadd.f32 %v1967_v58, %v2703_v18  ;;  %v1970_v63 = vadd.f32 %v1969_v61, %v1968_v59  ;;  %2218 = vmatprep.subr.bf16.mxu0 %v2735_v60 }
 0x1eb   :  { %2219 = vmatpush3.bf16.msra.mxu0 %v2735_v60 }
 0x1ec   :  { %v605_v0 = vadd.f32 %v1970_v63, %v2703_v18  ;;  %v646_v10 = vmul.f32 %v602_v62, %v2741_v7 }
 0x1ee   :  { %v647_v11 = vmul.f32 %v605_v0, %v2743_v8  ;;  %v1971_v1 = vpop.f32.mrb[16].mxu1 }
 0x1ef   :  { %v1972_v12 = vpop.f32.mrb[17].mxu1 }
 0x1f0   :  { %v1973_v14 = vadd.f32 %v1972_v12, %v1971_v1  ;;  %v1974_v15 = vpop.f32.mrb[18].mxu1  ;;  %v2747_v16 = vpack.c.bf16 %v647_v11, %v646_v10 }
 0x1f1   :  { %v1975_v2 = vpop.f32.mrb[19].mxu1 }
 0x1f2   :  { %v610_v5 = vadd.f32 %v1973_v14, %v2703_v18  ;;  %v1976_v20 = vadd.f32 %v1975_v2, %v1974_v15  ;;  %2220 = vmatprep.subr.bf16.mxu0 %v2747_v16  ;;  %v2789_v15 = vpop.permute.xlu0 %143  ;;  %v2791_v2 = vpop.permute.xlu1 %148 }
 0x1f3   :  { %2221 = vmatpush3.bf16.msra.mxu0 %v2747_v16 }
 0x1f4   :  { %v613_v6 = vadd.f32 %v1976_v20, %v2703_v18  ;;  %v648_v22 = vmul.f32 %v610_v5, %v2753_v21 }
 0x1f6   :  { %v649_v13 = vmul.f32 %v613_v6, %v2755_v9  ;;  %v1977_v4 = vpop.f32.mrb[20].mxu1 }
 0x1f7   :  { %v1978_v26 = vpop.f32.mrb[21].mxu1 }
 0x1f8   :  { %v1979_v30 = vadd.f32 %v1978_v26, %v1977_v4  ;;  %v1980_v32 = vpop.f32.mrb[22].mxu1  ;;  %v2759_v33 = vpack.c.bf16 %v649_v13, %v648_v22  ;;  %v2375_v22 = vld [vmem:[%s3123_s3 + $0xc0] sm:$0xff]   ;;  %v2377_v13 = vld [vmem:[%s3123_s3 + $0xc8] sm:$0xff]   ;;  %v2379_v26 = vld [vmem:[%s3123_s3 + $0xd0] sm:$0xff]  }
 0x1f9   :  { %v1981_v34 = vpop.f32.mrb[23].mxu1  ;;  %v2378_v4 = vld [vmem:[%s3123_s3 + $0x88] sm:$0xff]  }
 0x1fa   :  { %v618_v36 = vadd.f32 %v1979_v30, %v2703_v18  ;;  %v1982_v37 = vadd.f32 %v1981_v34, %v1980_v32  ;;  %2222 = vmatprep.subr.bf16.mxu0 %v2759_v33  ;;  %v2380_v30 = vld [vmem:[%s3123_s3 + $0x90] sm:$0xff]   ;;  %v2381_v32 = vld [vmem:[%s3123_s3 + $0xd8] sm:$0xff]  }
 0x1fb   :  { %2223 = vmatpush3.bf16.msra.mxu0 %v2759_v33  ;;  %v2382_v34 = vld [vmem:[%s3123_s3 + $0x98] sm:$0xff]  }
 0x1fc   :  { %v621_v38 = vadd.f32 %v1982_v37, %v2703_v18  ;;  %v650_v42 = vmul.f32 %v618_v36, %v2765_v39  ;;  %v2383_v36 = vld [vmem:[%s3123_s3 + $0xe0] sm:$0xff]  }
 0x1fd   :  { %v2384_v37 = vld [vmem:[%s3123_s3 + $0xa0] sm:$0xff]  }
 0x1fe   :  { %v651_v43 = vmul.f32 %v621_v38, %v2767_v41  ;;  %v1983_v44 = vpop.f32.mrb[24].mxu1  ;;  %v2385_v38 = vld [vmem:[%s3123_s3 + $0xe8] sm:$0xff]  }
 0x1ff   :  { %v1984_v45 = vpop.f32.mrb[25].mxu1 }
 0x200   :  { %v1985_v46 = vadd.f32 %v1984_v45, %v1983_v44  ;;  %v1986_v48 = vpop.f32.mrb[26].mxu1  ;;  %v2771_v49 = vpack.c.bf16 %v651_v43, %v650_v42  ;;  %v2386_v42 = vld [vmem:[%s3123_s3 + $0xa8] sm:$0xff]   ;;  %v2387_v43 = vld [vmem:[%s3123_s3 + $0xf0] sm:$0xff]   ;;  %v2389_v45 = vld [vmem:[%s3123_s3 + $0xf8] sm:$0xff]  }
 0x201   :  { %v1987_v50 = vpop.f32.mrb[27].mxu1  ;;  %v2388_v44 = vld [vmem:[%s3123_s3 + $0xb0] sm:$0xff]  }
 0x202   :  { %v626_v51 = vadd.f32 %v1985_v46, %v2703_v18  ;;  %v1988_v54 = vadd.f32 %v1987_v50, %v1986_v48  ;;  %2224 = vmatprep.subr.bf16.mxu0 %v2771_v49  ;;  %v2390_v46 = vld [vmem:[%s3123_s3 + $0xb8] sm:$0xff]  }
 0x203   :  { %2225 = vmatpush3.bf16.msra.mxu0 %v2771_v49 }
 0x204   :  { %v629_v55 = vadd.f32 %v1988_v54, %v2703_v18  ;;  %v652_v58 = vmul.f32 %v626_v51, %v2777_v56 }
 0x206   :  { %v653_v59 = vmul.f32 %v629_v55, %v2779_v57  ;;  %v1989_v61 = vpop.f32.mrb[28].mxu1 }
 0x207   :  { %v1990_v62 = vpop.f32.mrb[29].mxu1 }
 0x208   :  { %v1991_v63 = vadd.f32 %v1990_v62, %v1989_v61  ;;  %v1992_v0 = vpop.f32.mrb[30].mxu1  ;;  %v2783_v10 = vpack.c.bf16 %v653_v59, %v652_v58 }
 0x209   :  { %v1993_v11 = vpop.f32.mrb[31].mxu1 }
 0x20a   :  { %v634_v1 = vadd.f32 %v1991_v63, %v2703_v18  ;;  %v1994_v12 = vadd.f32 %v1993_v11, %v1992_v0  ;;  %2226 = vmatprep.subr.bf16.mxu0 %v2783_v10 }
 0x20b   :  { %2227 = vmatpush3.bf16.msra.mxu0 %v2783_v10 }
 0x20c   :  { %v637_v14 = vadd.f32 %v1994_v12, %v2703_v18  ;;  %v654_v5 = vmul.f32 %v634_v1, %v2789_v15  ;;  %v2376_v18 = vld [vmem:[%s3123_s3 + $0x80] sm:$0xff]  }
 0x20e   :  { %v655_v20 = vmul.f32 %v637_v14, %v2791_v2 }
 0x210   :  { %v2795_v6 = vpack.c.bf16 %v655_v20, %v654_v5 }
 0x212   :  { %2228 = vmatprep.subr.bf16.mxu0 %v2795_v6 }
 0x213   :  { %2229 = vmatpush3.bf16.msra.mxu0 %v2795_v6 }
 0x214   :  { %2011 = vmatprep.subr.bf16.mxu0 %v2375_v22 }
 0x216   :  { %2231 = vmatmul.mubr.bf16.vlgmr.msra.gmra.mrb[16].mxu0 %v2574_v17 }
 0x217   :  { %2234 = vmatprep.mubr.bf16.mxu0 %v2582_v19  ;;  %2012 = vmatpush3.bf16.msra.mxu0 %v2376_v18 }
 0x218   :  { %2013 = vmatprep.subr.bf16.mxu0 %v2377_v13 }
 0x21b   :  { %2014 = vmatpush3.bf16.msra.mxu0 %v2378_v4 }
 0x21c   :  { %2015 = vmatprep.subr.bf16.mxu0 %v2379_v26 }
 0x21e   :  { %2235 = vmatmul.mubr.bf16.gmra.mrb[20].mxu0 %v2602_v24 }
 0x21f   :  { %2238 = vmatprep.mubr.bf16.mxu0 %v2607_v25  ;;  %2016 = vmatpush3.bf16.msra.mxu0 %v2380_v30 }
 0x220   :  { %2017 = vmatprep.subr.bf16.mxu0 %v2381_v32 }
 0x223   :  { %2018 = vmatpush3.bf16.msra.mxu0 %v2382_v34 }
 0x224   :  { %2019 = vmatprep.subr.bf16.mxu0 %v2383_v36 }
 0x226   :  { %2239 = vmatmul.mubr.bf16.gmra.mrb[24].mxu0 %v2617_v27 }
 0x227   :  { %2242 = vmatprep.mubr.bf16.mxu0 %v2622_v28  ;;  %2020 = vmatpush3.bf16.msra.mxu0 %v2384_v37 }
 0x228   :  { %2021 = vmatprep.subr.bf16.mxu0 %v2385_v38 }
 0x22b   :  { %2022 = vmatpush3.bf16.msra.mxu0 %v2386_v42 }
 0x22c   :  { %2023 = vmatprep.subr.bf16.mxu0 %v2387_v43 }
 0x22e   :  { %2243 = vmatmul.mubr.bf16.gmra.mrb[28].mxu0 %v2629_v29 }
 0x22f   :  { %978 = vmatprep.mubr.bf16.mxu0 %v2713_v35  ;;  %2024 = vmatpush3.bf16.msra.mxu0 %v2388_v44 }
 0x230   :  { %2025 = vmatprep.subr.bf16.mxu0 %v2389_v45 }
 0x233   :  { %2026 = vmatpush3.bf16.msra.mxu0 %v2390_v46 }
 0x2e9   :  { %v2232_v48 = vpop.f32.mrb[16].mxu0 }
 0x2ea   :  { %v714_v50 = vpop.f32.mrb[17].mxu0 }
 0x2eb   :  { %v2233_v51 = vpop.f32.mrb[18].mxu0 }
 0x2ec   :  { %v778_v54 = vpack.c.bf16 %v2233_v51, %v2232_v48  ;;  %v717_v55 = vpop.f32.mrb[19].mxu0 }
 0x2ed   :  { %v777_v58 = vpack.c.bf16 %v717_v55, %v714_v50 }
 0x2ef   :  { %979 = vmatmul.mubr.bf16.vlgmr.msra.gmra.mrb[32].mxu0 %v777_v58 }
 0x2f0   :  { %986 = vmatprep.mubr.bf16.mxu0 %v2723_v47 }
 0x2f1   :  { %v2236_v35 = vpop.f32.mrb[20].mxu0 }
 0x2f2   :  { %v730_v59 = vpop.f32.mrb[21].mxu0 }
 0x2f3   :  { %v2237_v61 = vpop.f32.mrb[22].mxu0 }
 0x2f4   :  { %v780_v62 = vpack.c.bf16 %v2237_v61, %v2236_v35  ;;  %v733_v63 = vpop.f32.mrb[23].mxu0 }
 0x2f5   :  { %v779_v0 = vpack.c.bf16 %v733_v63, %v730_v59 }
 0x2f7   :  { %987 = vmatmul.mubr.bf16.gmra.mrb[36].mxu0 %v778_v54 }
 0x2f8   :  { %994 = vmatprep.mubr.bf16.mxu0 %v2735_v60 }
 0x2f9   :  { %v2240_v11 = vpop.f32.mrb[24].mxu0 }
 0x2fa   :  { %v746_v1 = vpop.f32.mrb[25].mxu0 }
 0x2fb   :  { %v2241_v12 = vpop.f32.mrb[26].mxu0 }
 0x2fc   :  { %v782_v14 = vpack.c.bf16 %v2241_v12, %v2240_v11  ;;  %v749_v5 = vpop.f32.mrb[27].mxu0 }
 0x2fd   :  { %v781_v20 = vpack.c.bf16 %v749_v5, %v746_v1 }
 0x2ff   :  { %995 = vmatmul.mubr.bf16.gmra.mrb[40].mxu0 %v779_v0 }
 0x300   :  { %1002 = vmatprep.mubr.bf16.mxu0 %v2747_v16  ;;  %v2865_v16 = vld [vmem:[%s3126_s4 + $0x1] ss:$0 sm:$0xff] }
 0x301   :  { %v2244_v22 = vpop.f32.mrb[28].mxu0 }
 0x302   :  { %v762_v47 = vpop.f32.mrb[29].mxu0 }
 0x303   :  { %v2245_v18 = vpop.f32.mrb[30].mxu0 }
 0x304   :  { %v784_v13 = vpack.c.bf16 %v2245_v18, %v2244_v22  ;;  %v765_v4 = vpop.f32.mrb[31].mxu0 }
 0x305   :  { %v783_v26 = vpack.c.bf16 %v765_v4, %v762_v47 }
 0x307   :  { %1003 = vmatmul.mubr.bf16.gmra.mrb[44].mxu0 %v780_v62 }
 0x308   :  { %1010 = vmatprep.mubr.bf16.mxu0 %v2759_v33 }
 0x30f   :  { %1011 = vmatmul.mubr.bf16.gmra.mrb[48].mxu0 %v781_v20 }
 0x310   :  { %1018 = vmatprep.mubr.bf16.mxu0 %v2771_v49 }
 0x317   :  { %1019 = vmatmul.mubr.bf16.gmra.mrb[52].mxu0 %v782_v14 }
 0x318   :  { %1026 = vmatprep.mubr.bf16.mxu0 %v2783_v10 }
 0x31f   :  { %1027 = vmatmul.mubr.bf16.gmra.mrb[56].mxu0 %v783_v26 }
 0x320   :  { %1034 = vmatprep.mubr.bf16.mxu0 %v2795_v6 }
 0x327   :  { %1035 = vmatmul.mubr.bf16.gmra.mrb[60].mxu0 %v784_v13 }
 0x3c2   :  { %v2027_v60 = vpop.f32.mrb[32].mxu0 }
 0x3c3   :  { %v2028_v30 = vpop.f32.mrb[33].mxu0 }
 0x3c4   :  { %v2029_v32 = vadd.f32 %v2028_v30, %v2027_v60  ;;  %v2030_v34 = vpop.f32.mrb[34].mxu0 }
 0x3c5   :  { %v2031_v33 = vpop.f32.mrb[35].mxu0 }
 0x3c6   :  { %v981_v36 = vadd.f32 %v2029_v32, %v2865_v16  ;;  %v2032_v49 = vadd.f32 %v2031_v33, %v2030_v34 }
 0x3c8   :  { %v984_v37 = vadd.f32 %v2032_v49, %v2865_v16  ;;  %v1043_v10 = vmul.f32 %v981_v36, %v2698_v3 }
 0x3ca   :  { %v1044_v6 = vmul.f32 %v984_v37, %v2707_v23  ;;  %v2033_v38 = vpop.f32.mrb[36].mxu0 }
 0x3cb   :  { %v2034_v42 = vpop.f32.mrb[37].mxu0 }
 0x3cc   :  { %v2035_v43 = vadd.f32 %v2034_v42, %v2033_v38  ;;  %v2036_v44 = vpop.f32.mrb[38].mxu0  ;;  %v2871_v45 = vpack.c.bf16 %v1044_v6, %v1043_v10 }
 0x3cd   :  { %v2037_v46 = vpop.f32.mrb[39].mxu0 }
 0x3ce   :  { %v989_v48 = vadd.f32 %v2035_v43, %v2865_v16  ;;  %v2038_v50 = vadd.f32 %v2037_v46, %v2036_v44  ;;  %2246 = vmatprep.subr.bf16.mxu1 %v2871_v45 }
 0x3cf   :  { %2247 = vmatpush3.bf16.msra.mxu1 %v2871_v45 }
 0x3d0   :  { %v992_v51 = vadd.f32 %v2038_v50, %v2865_v16  ;;  %v1045_v54 = vmul.f32 %v989_v48, %v2711_v31 }
 0x3d2   :  { %v1046_v55 = vmul.f32 %v992_v51, %v2719_v40  ;;  %v2039_v58 = vpop.f32.mrb[40].mxu0 }
 0x3d3   :  { %v2040_v35 = vpop.f32.mrb[41].mxu0 }
 0x3d4   :  { %v2041_v59 = vadd.f32 %v2040_v35, %v2039_v58  ;;  %v2042_v61 = vpop.f32.mrb[42].mxu0  ;;  %v2879_v62 = vpack.c.bf16 %v1046_v55, %v1045_v54 }
 0x3d5   :  { %v2043_v63 = vpop.f32.mrb[43].mxu0 }
 0x3d6   :  { %v997_v0 = vadd.f32 %v2041_v59, %v2865_v16  ;;  %v2044_v11 = vadd.f32 %v2043_v63, %v2042_v61  ;;  %2248 = vmatprep.subr.bf16.mxu1 %v2879_v62 }
 0x3d7   :  { %2249 = vmatpush3.bf16.msra.mxu1 %v2879_v62 }
 0x3d8   :  { %v1000_v1 = vadd.f32 %v2044_v11, %v2865_v16  ;;  %v1047_v12 = vmul.f32 %v997_v0, %v2729_v52 }
 0x3da   :  { %v1048_v14 = vmul.f32 %v1000_v1, %v2731_v53  ;;  %v2045_v5 = vpop.f32.mrb[44].mxu0 }
 0x3db   :  { %v2046_v20 = vpop.f32.mrb[45].mxu0 }
 0x3dc   :  { %v2047_v22 = vadd.f32 %v2046_v20, %v2045_v5  ;;  %v2048_v47 = vpop.f32.mrb[46].mxu0  ;;  %v2887_v18 = vpack.c.bf16 %v1048_v14, %v1047_v12 }
 0x3dd   :  { %v2049_v13 = vpop.f32.mrb[47].mxu0 }
 0x3de   :  { %v1005_v4 = vadd.f32 %v2047_v22, %v2865_v16  ;;  %v2050_v26 = vadd.f32 %v2049_v13, %v2048_v47  ;;  %2250 = vmatprep.subr.bf16.mxu1 %v2887_v18 }
 0x3df   :  { %2251 = vmatpush3.bf16.msra.mxu1 %v2887_v18 }
 0x3e0   :  { %v1008_v60 = vadd.f32 %v2050_v26, %v2865_v16  ;;  %v1049_v30 = vmul.f32 %v1005_v4, %v2741_v7 }
 0x3e2   :  { %v1050_v32 = vmul.f32 %v1008_v60, %v2743_v8  ;;  %v2051_v34 = vpop.f32.mrb[48].mxu0 }
 0x3e3   :  { %v2052_v33 = vpop.f32.mrb[49].mxu0 }
 0x3e4   :  { %v2053_v36 = vadd.f32 %v2052_v33, %v2051_v34  ;;  %v2054_v49 = vpop.f32.mrb[50].mxu0  ;;  %v2895_v37 = vpack.c.bf16 %v1050_v32, %v1049_v30 }
 0x3e5   :  { %v2055_v10 = vpop.f32.mrb[51].mxu0 }
 0x3e6   :  { %v1013_v6 = vadd.f32 %v2053_v36, %v2865_v16  ;;  %v2056_v38 = vadd.f32 %v2055_v10, %v2054_v49  ;;  %2252 = vmatprep.subr.bf16.mxu1 %v2895_v37 }
 0x3e7   :  { %2253 = vmatpush3.bf16.msra.mxu1 %v2895_v37 }
 0x3e8   :  { %v1016_v42 = vadd.f32 %v2056_v38, %v2865_v16  ;;  %v1051_v43 = vmul.f32 %v1013_v6, %v2753_v21 }
 0x3ea   :  { %v1052_v44 = vmul.f32 %v1016_v42, %v2755_v9  ;;  %v2057_v46 = vpop.f32.mrb[52].mxu0 }
 0x3eb   :  { %v2058_v48 = vpop.f32.mrb[53].mxu0 }
 0x3ec   :  { %v2059_v50 = vadd.f32 %v2058_v48, %v2057_v46  ;;  %v2060_v51 = vpop.f32.mrb[54].mxu0  ;;  %v2903_v54 = vpack.c.bf16 %v1052_v44, %v1051_v43  ;;  %v2391_v43 = vld [vmem:[%s3123_s3 + $0x140] sm:$0xff]   ;;  %v2394_v46 = vld [vmem:[%s3123_s3 + $0x108] sm:$0xff]   ;;  %v2395_v48 = vld [vmem:[%s3123_s3 + $0x150] sm:$0xff]  }
 0x3ed   :  { %v2061_v55 = vpop.f32.mrb[55].mxu0  ;;  %v2392_v44 = vld [vmem:[%s3123_s3 + $0x100] sm:$0xff]  }
 0x3ee   :  { %v1021_v58 = vadd.f32 %v2059_v50, %v2865_v16  ;;  %v2062_v35 = vadd.f32 %v2061_v55, %v2060_v51  ;;  %2254 = vmatprep.subr.bf16.mxu1 %v2903_v54  ;;  %v2396_v50 = vld [vmem:[%s3123_s3 + $0x110] sm:$0xff]   ;;  %v2399_v51 = vld [vmem:[%s3123_s3 + $0x160] sm:$0xff]  }
 0x3ef   :  { %2255 = vmatpush3.bf16.msra.mxu1 %v2903_v54  ;;  %v2400_v55 = vld [vmem:[%s3123_s3 + $0x120] sm:$0xff]  }
 0x3f0   :  { %v1024_v59 = vadd.f32 %v2062_v35, %v2865_v16  ;;  %v1053_v61 = vmul.f32 %v1021_v58, %v2765_v39  ;;  %v2403_v58 = vld [vmem:[%s3123_s3 + $0x170] sm:$0xff]  }
 0x3f1   :  { %v2404_v35 = vld [vmem:[%s3123_s3 + $0x130] sm:$0xff]  }
 0x3f2   :  { %v1054_v63 = vmul.f32 %v1024_v59, %v2767_v41  ;;  %v2063_v0 = vpop.f32.mrb[56].mxu0 }
 0x3f3   :  { %v2064_v11 = vpop.f32.mrb[57].mxu0 }
 0x3f4   :  { %v2065_v1 = vadd.f32 %v2064_v11, %v2063_v0  ;;  %v2066_v12 = vpop.f32.mrb[58].mxu0  ;;  %v2911_v14 = vpack.c.bf16 %v1054_v63, %v1053_v61 }
 0x3f5   :  { %v2067_v5 = vpop.f32.mrb[59].mxu0 }
 0x3f6   :  { %v1029_v20 = vadd.f32 %v2065_v1, %v2865_v16  ;;  %v2068_v22 = vadd.f32 %v2067_v5, %v2066_v12  ;;  %2256 = vmatprep.subr.bf16.mxu1 %v2911_v14 }
 0x3f7   :  { %2257 = vmatpush3.bf16.msra.mxu1 %v2911_v14 }
 0x3f8   :  { %v1032_v47 = vadd.f32 %v2068_v22, %v2865_v16  ;;  %v1055_v13 = vmul.f32 %v1029_v20, %v2777_v56 }
 0x3fa   :  { %v1056_v4 = vmul.f32 %v1032_v47, %v2779_v57  ;;  %v2069_v26 = vpop.f32.mrb[60].mxu0 }
 0x3fb   :  { %v2070_v60 = vpop.f32.mrb[61].mxu0 }
 0x3fc   :  { %v2071_v30 = vadd.f32 %v2070_v60, %v2069_v26  ;;  %v2072_v32 = vpop.f32.mrb[62].mxu0  ;;  %v2919_v34 = vpack.c.bf16 %v1056_v4, %v1055_v13 }
 0x3fd   :  { %v2073_v33 = vpop.f32.mrb[63].mxu0 }
 0x3fe   :  { %v1037_v36 = vadd.f32 %v2071_v30, %v2865_v16  ;;  %v2074_v49 = vadd.f32 %v2073_v33, %v2072_v32  ;;  %2258 = vmatprep.subr.bf16.mxu1 %v2919_v34 }
 0x3ff   :  { %2259 = vmatpush3.bf16.msra.mxu1 %v2919_v34 }
 0x400   :  { %v1040_v10 = vadd.f32 %v2074_v49, %v2865_v16  ;;  %v1057_v6 = vmul.f32 %v1037_v36, %v2789_v15  ;;  %v2393_v16 = vld [vmem:[%s3123_s3 + $0x148] sm:$0xff]  }
 0x402   :  { %v1058_v38 = vmul.f32 %v1040_v10, %v2791_v2 }
 0x404   :  { %v2927_v42 = vpack.c.bf16 %v1058_v38, %v1057_v6 }
 0x406   :  { %2260 = vmatprep.subr.bf16.mxu1 %v2927_v42 }
 0x407   :  { %2261 = vmatpush3.bf16.msra.mxu1 %v2927_v42 }
 0x408   :  { %2091 = vmatprep.subr.bf16.mxu1 %v2391_v43 }
 0x40a   :  { %2263 = vmatmul.mubr.bf16.vlgmr.msra.gmra.mrb[32].mxu1 %v2574_v17  ;;  %v2397_v17 = vld [vmem:[%s3123_s3 + $0x158] sm:$0xff]  }
 0x40b   :  { %2266 = vmatprep.mubr.bf16.mxu1 %v2582_v19  ;;  %2092 = vmatpush3.bf16.msra.mxu1 %v2392_v44  ;;  %v2398_v19 = vld [vmem:[%s3123_s3 + $0x118] sm:$0xff]  }
 0x40c   :  { %2093 = vmatprep.subr.bf16.mxu1 %v2393_v16 }
 0x40f   :  { %2094 = vmatpush3.bf16.msra.mxu1 %v2394_v46 }
 0x410   :  { %2095 = vmatprep.subr.bf16.mxu1 %v2395_v48 }
 0x412   :  { %2267 = vmatmul.mubr.bf16.gmra.mrb[36].mxu1 %v2602_v24  ;;  %v2401_v24 = vld [vmem:[%s3123_s3 + $0x168] sm:$0xff]  }
 0x413   :  { %2270 = vmatprep.mubr.bf16.mxu1 %v2607_v25  ;;  %2096 = vmatpush3.bf16.msra.mxu1 %v2396_v50  ;;  %v2402_v25 = vld [vmem:[%s3123_s3 + $0x128] sm:$0xff]  }
 0x414   :  { %2097 = vmatprep.subr.bf16.mxu1 %v2397_v17 }
 0x417   :  { %2098 = vmatpush3.bf16.msra.mxu1 %v2398_v19 }
 0x418   :  { %2099 = vmatprep.subr.bf16.mxu1 %v2399_v51 }
 0x41a   :  { %2271 = vmatmul.mubr.bf16.gmra.mrb[40].mxu1 %v2617_v27  ;;  %v2405_v27 = vld [vmem:[%s3123_s3 + $0x178] sm:$0xff]  }
 0x41b   :  { %2274 = vmatprep.mubr.bf16.mxu1 %v2622_v28  ;;  %2100 = vmatpush3.bf16.msra.mxu1 %v2400_v55  ;;  %v2406_v28 = vld [vmem:[%s3123_s3 + $0x138] sm:$0xff]  }
 0x41c   :  { %2101 = vmatprep.subr.bf16.mxu1 %v2401_v24 }
 0x41f   :  { %2102 = vmatpush3.bf16.msra.mxu1 %v2402_v25 }
 0x420   :  { %2103 = vmatprep.subr.bf16.mxu1 %v2403_v58 }
 0x422   :  { %2275 = vmatmul.mubr.bf16.gmra.mrb[44].mxu1 %v2629_v29 }
 0x423   :  { %1381 = vmatprep.mubr.bf16.mxu1 %v2871_v45  ;;  %2104 = vmatpush3.bf16.msra.mxu1 %v2404_v35 }
 0x424   :  { %2105 = vmatprep.subr.bf16.mxu1 %v2405_v27 }
 0x427   :  { %2106 = vmatpush3.bf16.msra.mxu1 %v2406_v28 }
 0x4dd   :  { %v2264_v59 = vpop.f32.mrb[32].mxu1 }
 0x4de   :  { %v1117_v61 = vpop.f32.mrb[33].mxu1 }
 0x4df   :  { %v2265_v63 = vpop.f32.mrb[34].mxu1 }
 0x4e0   :  { %v1181_v0 = vpack.c.bf16 %v2265_v63, %v2264_v59  ;;  %v1120_v11 = vpop.f32.mrb[35].mxu1 }
 0x4e1   :  { %v1180_v1 = vpack.c.bf16 %v1120_v11, %v1117_v61 }
 0x4e3   :  { %1382 = vmatmul.mubr.bf16.vlgmr.msra.gmra.mrb[48].mxu1 %v1180_v1 }
 0x4e4   :  { %1389 = vmatprep.mubr.bf16.mxu1 %v2879_v62 }
 0x4e5   :  { %v2268_v29 = vpop.f32.mrb[36].mxu1 }
 0x4e6   :  { %v1133_v45 = vpop.f32.mrb[37].mxu1 }
 0x4e7   :  { %v2269_v12 = vpop.f32.mrb[38].mxu1 }
 0x4e8   :  { %v1183_v5 = vpack.c.bf16 %v2269_v12, %v2268_v29  ;;  %v1136_v20 = vpop.f32.mrb[39].mxu1 }
 0x4e9   :  { %v1182_v22 = vpack.c.bf16 %v1136_v20, %v1133_v45 }
 0x4eb   :  { %1390 = vmatmul.mubr.bf16.gmra.mrb[52].mxu1 %v1181_v0 }
 0x4ec   :  { %1397 = vmatprep.mubr.bf16.mxu1 %v2887_v18  ;;  %v2428_v18 = vmov 0.0  }
 0x4ed   :  { %v2272_v47 = vpop.f32.mrb[40].mxu1  ;;  %2278 = vmatprep.subr.bf16.mxu0 %v2428_v18  ;;  %2318 = vmatprep.subr.bf16.mxu1 %v2428_v18 }
 0x4ee   :  { %v1149_v13 = vpop.f32.mrb[41].mxu1  ;;  %2294 = vmatprep.mubr.msk.bf16.mxu0 %vm2429_vm0, %v2428_v18 }
 0x4ef   :  { %v2273_v4 = vpop.f32.mrb[42].mxu1 }
 0x4f0   :  { %v1185_v26 = vpack.c.bf16 %v2273_v4, %v2272_v47  ;;  %v1152_v60 = vpop.f32.mrb[43].mxu1 }
 0x4f1   :  { %v1184_v30 = vpack.c.bf16 %v1152_v60, %v1149_v13 }
 0x4f3   :  { %1398 = vmatmul.mubr.bf16.gmra.mrb[56].mxu1 %v1182_v22 }
 0x4f4   :  { %1405 = vmatprep.mubr.bf16.mxu1 %v2895_v37 }
 0x4f5   :  { %v2276_v32 = vpop.f32.mrb[44].mxu1 }
 0x4f6   :  { %v1165_v62 = vpop.f32.mrb[45].mxu1 }
 0x4f7   :  { %v2277_v33 = vpop.f32.mrb[46].mxu1 }
 0x4f8   :  { %v1187_v36 = vpack.c.bf16 %v2277_v33, %v2276_v32  ;;  %v1168_v49 = vpop.f32.mrb[47].mxu1 }
 0x4f9   :  { %v1186_v10 = vpack.c.bf16 %v1168_v49, %v1165_v62 }
 0x4fb   :  { %1406 = vmatmul.mubr.bf16.gmra.mrb[60].mxu1 %v1183_v5 }
 0x4fc   :  { %1413 = vmatprep.mubr.bf16.mxu1 %v2903_v54  ;;  %v3003_v54 = vld [vmem:[%s3126_s4 + $0x2] ss:$0 sm:$0xff] }
 0x503   :  { %1414 = vmatmul.mubr.bf16.gmra.mrb[64].mxu1 %v1184_v30 }
 0x504   :  { %1421 = vmatprep.mubr.bf16.mxu1 %v2911_v14 }
 0x50b   :  { %1422 = vmatmul.mubr.bf16.gmra.mrb[68].mxu1 %v1185_v26 }
 0x50c   :  { %1429 = vmatprep.mubr.bf16.mxu1 %v2919_v34 }
 0x513   :  { %1430 = vmatmul.mubr.bf16.gmra.mrb[72].mxu1 %v1186_v10 }
 0x514   :  { %1437 = vmatprep.mubr.bf16.mxu1 %v2927_v42 }
 0x51b   :  { %1438 = vmatmul.mubr.bf16.gmra.mrb[76].mxu1 %v1187_v36 }
 0x51c   :  { %2334 = vmatprep.mubr.msk.bf16.mxu1 %vm2429_vm0, %v2428_v18 }
 0x5b6   :  { %v2107_v37 = vpop.f32.mrb[48].mxu1 }
 0x5b7   :  { %v2108_v14 = vpop.f32.mrb[49].mxu1 }
 0x5b8   :  { %v2109_v34 = vadd.f32 %v2108_v14, %v2107_v37  ;;  %v2110_v6 = vpop.f32.mrb[50].mxu1 }
 0x5b9   :  { %v2111_v38 = vpop.f32.mrb[51].mxu1 }
 0x5ba   :  { %v1384_v42 = vadd.f32 %v2109_v34, %v3003_v54  ;;  %v2112_v43 = vadd.f32 %v2111_v38, %v2110_v6 }
 0x5bc   :  { %v1387_v44 = vadd.f32 %v2112_v43, %v3003_v54  ;;  %v1446_v16 = vmul.f32 %v1384_v42, %v2698_v3 }
 0x5be   :  { %v1447_v46 = vmul.f32 %v1387_v44, %v2707_v23  ;;  %v2113_v48 = vpop.f32.mrb[52].mxu1 }
 0x5bf   :  { %v2114_v50 = vpop.f32.mrb[53].mxu1 }
 0x5c0   :  { %v1462_v17 = vpack.c.bf16 %v1447_v46, %v1446_v16  ;;  %v2115_v19 = vadd.f32 %v2114_v50, %v2113_v48  ;;  %v2116_v51 = vpop.f32.mrb[54].mxu1 }
 0x5c1   :  { %v2117_v55 = vpop.f32.mrb[55].mxu1 }
 0x5c2   :  { %v1392_v24 = vadd.f32 %v2115_v19, %v3003_v54  ;;  %v2118_v25 = vadd.f32 %v2117_v55, %v2116_v51  ;;  %2279 = vmatpush3.bf16.msra.mxu0 %v1462_v17 }
 0x5c3   :  { %2280 = vmatprep.subr.bf16.mxu0 %v2428_v18 }
 0x5c4   :  { %v1395_v58 = vadd.f32 %v2118_v25, %v3003_v54  ;;  %v1448_v35 = vmul.f32 %v1392_v24, %v2711_v31 }
 0x5c6   :  { %v1449_v3 = vmul.f32 %v1395_v58, %v2719_v40  ;;  %v2119_v27 = vpop.f32.mrb[56].mxu1 }
 0x5c7   :  { %v2120_v23 = vpop.f32.mrb[57].mxu1 }
 0x5c8   :  { %v1463_v28 = vpack.c.bf16 %v1449_v3, %v1448_v35  ;;  %v2121_v59 = vadd.f32 %v2120_v23, %v2119_v27  ;;  %v2122_v61 = vpop.f32.mrb[58].mxu1 }
 0x5c9   :  { %v2123_v63 = vpop.f32.mrb[59].mxu1 }
 0x5ca   :  { %v1400_v0 = vadd.f32 %v2121_v59, %v3003_v54  ;;  %v2124_v11 = vadd.f32 %v2123_v63, %v2122_v61  ;;  %2281 = vmatpush3.bf16.msra.mxu0 %v1463_v28 }
 0x5cb   :  { %2282 = vmatprep.subr.bf16.mxu0 %v2428_v18 }
 0x5cc   :  { %v1403_v1 = vadd.f32 %v2124_v11, %v3003_v54  ;;  %v1450_v29 = vmul.f32 %v1400_v0, %v2729_v52 }
 0x5ce   :  { %v1451_v31 = vmul.f32 %v1403_v1, %v2731_v53  ;;  %v2125_v45 = vpop.f32.mrb[60].mxu1  ;;  %v2407_v1 = vld [vmem:[%s3127_s7] sm:$0xff]  }
 0x5cf   :  { %v2126_v40 = vpop.f32.mrb[61].mxu1 }
 0x5d0   :  { %v1464_v12 = vpack.c.bf16 %v1451_v31, %v1450_v29  ;;  %v2127_v5 = vadd.f32 %v2126_v40, %v2125_v45  ;;  %v2128_v20 = vpop.f32.mrb[62].mxu1  ;;  %v2411_v29 = vld [vmem:[%s3127_s7 + $0x20] sm:$0xff]   ;;  %v2412_v31 = vld [vmem:[%s3127_s7 + $0x28] sm:$0xff]   ;;  %v2413_v45 = vld [vmem:[%s3127_s7 + $0x30] sm:$0xff]  }
 0x5d1   :  { %v2129_v22 = vpop.f32.mrb[63].mxu1  ;;  %v2414_v40 = vld [vmem:[%s3127_s7 + $0x38] sm:$0xff]  }
 0x5d2   :  { %v1408_v47 = vadd.f32 %v2127_v5, %v3003_v54  ;;  %v2130_v13 = vadd.f32 %v2129_v22, %v2128_v20  ;;  %2283 = vmatpush3.bf16.msra.mxu0 %v1464_v12  ;;  %v2415_v12 = vld [vmem:[%s3129_s9] sm:$0xff]   ;;  %v2416_v5 = vld [vmem:[%s3129_s9 + $0x8] sm:$0xff]   ;;  %v2417_v20 = vld [vmem:[%s3129_s9 + $0x10] sm:$0xff]  }
 0x5d3   :  { %2284 = vmatprep.subr.bf16.mxu0 %v2428_v18  ;;  %2319 = vmatpush3.bf16.msra.mxu1 %v2415_v12  ;;  %v2418_v22 = vld [vmem:[%s3129_s9 + $0x18] sm:$0xff]  }
 0x5d4   :  { %v1411_v4 = vadd.f32 %v2130_v13, %v3003_v54  ;;  %v1452_v26 = vmul.f32 %v1408_v47, %v2741_v7  ;;  %2320 = vmatprep.subr.bf16.mxu1 %v2428_v18  ;;  %v2419_v47 = vld [vmem:[%s3129_s9 + $0x20] sm:$0xff]   ;;  %v2420_v13 = vld [vmem:[%s3129_s9 + $0x28] sm:$0xff]  }
 0x5d6   :  { %v1453_v52 = vmul.f32 %v1411_v4, %v2743_v8  ;;  %v2131_v60 = vpop.f32.mrb[64].mxu1  ;;  %v2421_v4 = vld [vmem:[%s3129_s9 + $0x30] sm:$0xff]  }
 0x5d7   :  { %v2132_v53 = vpop.f32.mrb[65].mxu1  ;;  %2321 = vmatpush3.bf16.msra.mxu1 %v2416_v5 }
 0x5d8   :  { %v1465_v30 = vpack.c.bf16 %v1453_v52, %v1452_v26  ;;  %v2133_v32 = vadd.f32 %v2132_v53, %v2131_v60  ;;  %v2134_v62 = vpop.f32.mrb[66].mxu1  ;;  %2322 = vmatprep.subr.bf16.mxu1 %v2428_v18  ;;  %v1531_v26 = vpop.permute.xlu0 %1530 }
 0x5d9   :  { %v2135_v33 = vpop.f32.mrb[67].mxu1 }
 0x5da   :  { %v1416_v36 = vadd.f32 %v2133_v32, %v3003_v54  ;;  %v2136_v49 = vadd.f32 %v2135_v33, %v2134_v62  ;;  %2285 = vmatpush3.bf16.msra.mxu0 %v1465_v30  ;;  %v2422_v33 = vld [vmem:[%s3129_s9 + $0x38] sm:$0xff]  }
 0x5db   :  { %2286 = vmatprep.subr.bf16.mxu0 %v2428_v18  ;;  %2323 = vmatpush3.bf16.msra.mxu1 %v2417_v20 }
 0x5dc   :  { %v1419_v10 = vadd.f32 %v2136_v49, %v3003_v54  ;;  %v1454_v37 = vmul.f32 %v1416_v36, %v2753_v21  ;;  %2324 = vmatprep.subr.bf16.mxu1 %v2428_v18  ;;  %v1551_v36 = vld [vmem:[%s3130_s8] sm:$0xff] }
 0x5de   :  { %v1455_v7 = vmul.f32 %v1419_v10, %v2755_v9  ;;  %v2137_v14 = vpop.f32.mrb[68].mxu1 }
 0x5df   :  { %v2138_v8 = vpop.f32.mrb[69].mxu1  ;;  %2325 = vmatpush3.bf16.msra.mxu1 %v2418_v22 }
 0x5e0   :  { %v1466_v34 = vpack.c.bf16 %v1455_v7, %v1454_v37  ;;  %v2139_v6 = vadd.f32 %v2138_v8, %v2137_v14  ;;  %v2140_v38 = vpop.f32.mrb[70].mxu1  ;;  %2326 = vmatprep.subr.bf16.mxu1 %v2428_v18 }
 0x5e1   :  { %v2141_v42 = vpop.f32.mrb[71].mxu1 }
 0x5e2   :  { %v1424_v43 = vadd.f32 %v2139_v6, %v3003_v54  ;;  %v2142_v44 = vadd.f32 %v2141_v42, %v2140_v38  ;;  %2287 = vmatpush3.bf16.msra.mxu0 %v1466_v34  ;;  %v1747_v34 = vlaneseq  ;;  %v1658_v38 = vld [vmem:[%s3131_s10] sm:$0xff] }
 0x5e3   :  { %2288 = vmatprep.subr.bf16.mxu0 %v2428_v18  ;;  %2327 = vmatpush3.bf16.msra.mxu1 %v2419_v47 }
 0x5e4   :  { %v1427_v16 = vadd.f32 %v2142_v44, %v3003_v54  ;;  %v1456_v46 = vmul.f32 %v1424_v43, %v2765_v39  ;;  %2328 = vmatprep.subr.bf16.mxu1 %v2428_v18  ;;  %v1748_v6 = vand.u32 127, %v1747_v34 }
 0x5e6   :  { %v1457_v21 = vmul.f32 %v1427_v16, %v2767_v41  ;;  %v2143_v48 = vpop.f32.mrb[72].mxu1  ;;  %vm1749_vm1 = vcmp.lt.s32.totalorder %v1748_v6, 4 }
 0x5e7   :  { %v2144_v9 = vpop.f32.mrb[73].mxu1  ;;  %2329 = vmatpush3.bf16.msra.mxu1 %v2420_v13 }
 0x5e8   :  { %v1467_v50 = vpack.c.bf16 %v1457_v21, %v1456_v46  ;;  %v2145_v17 = vadd.f32 %v2144_v9, %v2143_v48  ;;  %v2146_v19 = vpop.f32.mrb[74].mxu1  ;;  %2330 = vmatprep.subr.bf16.mxu1 %v2428_v18 }
 0x5e9   :  { %v2147_v51 = vpop.f32.mrb[75].mxu1 }
 0x5ea   :  { %v1432_v55 = vadd.f32 %v2145_v17, %v3003_v54  ;;  %v2148_v24 = vadd.f32 %v2147_v51, %v2146_v19  ;;  %2289 = vmatpush3.bf16.msra.mxu0 %v1467_v50 }
 0x5eb   :  { %2290 = vmatprep.subr.bf16.mxu0 %v2428_v18  ;;  %2331 = vmatpush3.bf16.msra.mxu1 %v2421_v4 }
 0x5ec   :  { %v1435_v25 = vadd.f32 %v2148_v24, %v3003_v54  ;;  %v1458_v58 = vmul.f32 %v1432_v55, %v2777_v56  ;;  %2332 = vmatprep.subr.bf16.mxu1 %v2428_v18 }
 0x5ee   :  { %v1459_v39 = vmul.f32 %v1435_v25, %v2779_v57  ;;  %v2149_v35 = vpop.f32.mrb[76].mxu1  ;;  %v1486_v57 = vld [vmem:[%s3128_s5] sm:$0xf] }
 0x5ef   :  { %v2150_v41 = vpop.f32.mrb[77].mxu1  ;;  %2333 = vmatpush3.bf16.msra.mxu1 %v2422_v33 }
 0x5f0   :  { %v1468_v3 = vpack.c.bf16 %v1459_v39, %v1458_v58  ;;  %v2151_v27 = vadd.f32 %v2150_v41, %v2149_v35  ;;  %v2152_v23 = vpop.f32.mrb[78].mxu1 }
 0x5f1   :  { %v2153_v28 = vpop.f32.mrb[79].mxu1 }
 0x5f2   :  { %v1440_v59 = vadd.f32 %v2151_v27, %v3003_v54  ;;  %v2154_v61 = vadd.f32 %v2153_v28, %v2152_v23  ;;  %2291 = vmatpush3.bf16.msra.mxu0 %v1468_v3 }
 0x5f3   :  { %2292 = vmatprep.subr.bf16.mxu0 %v2428_v18 }
 0x5f4   :  { %v1443_v63 = vadd.f32 %v2154_v61, %v3003_v54  ;;  %v1460_v0 = vmul.f32 %v1440_v59, %v2789_v15  ;;  %v2408_v15 = vld [vmem:[%s3127_s7 + $0x8] sm:$0xff]   ;;  %v2410_v54 = vld [vmem:[%s3127_s7 + $0x18] sm:$0xff]  }
 0x5f6   :  { %v1461_v56 = vmul.f32 %v1443_v63, %v2791_v2  ;;  %v2409_v2 = vld [vmem:[%s3127_s7 + $0x10] sm:$0xff]  }
 0x5f8   :  { %v1469_v11 = vpack.c.bf16 %v1461_v56, %v1460_v0 }
 0x5fa   :  { %2293 = vmatpush3.bf16.msra.mxu0 %v1469_v11 }
 0x5fb   :  { %2298 = vmatprep.subr.bf16.mxu0 %v2428_v18 }
 0x5fd   :  { %2295 = vmatmul.mubr.bf16.vlgmr.msra.gmra.mrb[64].mxu0 %v1486_v57 }
 0x5fe   :  { %2299 = vmatpush3.bf16.msra.mxu0 %v2407_v1  ;;  %2314 = vmatprep.mubr.msk.bf16.mxu0 %vm2429_vm0, %v2428_v18 }
 0x5ff   :  { %2300 = vmatprep.subr.bf16.mxu0 %v2428_v18 }
 0x602   :  { %2301 = vmatpush3.bf16.msra.mxu0 %v2408_v15 }
 0x603   :  { %2302 = vmatprep.subr.bf16.mxu0 %v2428_v18 }
 0x606   :  { %2303 = vmatpush3.bf16.msra.mxu0 %v2409_v2 }
 0x607   :  { %2304 = vmatprep.subr.bf16.mxu0 %v2428_v18 }
 0x60a   :  { %2305 = vmatpush3.bf16.msra.mxu0 %v2410_v54 }
 0x60b   :  { %2306 = vmatprep.subr.bf16.mxu0 %v2428_v18 }
 0x60e   :  { %2307 = vmatpush3.bf16.msra.mxu0 %v2411_v29 }
 0x60f   :  { %2308 = vmatprep.subr.bf16.mxu0 %v2428_v18 }
 0x612   :  { %2309 = vmatpush3.bf16.msra.mxu0 %v2412_v31 }
 0x613   :  { %2310 = vmatprep.subr.bf16.mxu0 %v2428_v18 }
 0x616   :  { %2311 = vmatpush3.bf16.msra.mxu0 %v2413_v45 }
 0x617   :  { %2312 = vmatprep.subr.bf16.mxu0 %v2428_v18 }
 0x61a   :  { %2313 = vmatpush3.bf16.msra.mxu0 %v2414_v40 }
 0x6d0   :  { %v1521_v52 = vpop.f32.mrb[64].mxu0 }
 0x6d1   :  { %v1533_v60 = vmul.f32 %v1531_v26, %v1521_v52  ;;  %v2296_v53 = vpop.f32.mrb[65].mxu0 }
 0x6d2   :  { %v1524_v30 = vpop.f32.mrb[66].mxu0 }
 0x6d3   :  { %v1534_v32 = vpack.c.bf16 %v1533_v60, %v1533_v60  ;;  %v2297_v62 = vpop.f32.mrb[67].mxu0 }
 0x6d5   :  { %2315 = vmatmul.mubr.bf16.vlgmr.msra.gmra.mrb[68].mxu0 %v1534_v32 }
 0x7a8   :  { %v1634_v49 = vpop.f32.mrb[68].mxu0 }
 0x7a9   :  { %v1635_v10 = vadd.f32 %v1634_v49, %v1551_v36  ;;  %v2316_v18 = vpop.f32.mrb[69].mxu0 }
 0x7aa   :  { %v1637_v37 = vpop.f32.mrb[70].mxu0 }
 0x7ab   :  { %v1640_v7 = vmax.f32 %v1635_v10, 0.0  ;;  %v2317_v14 = vpop.f32.mrb[71].mxu0 }
 0x7ad   :  { %v1641_v8 = vpack.c.bf16 %v1640_v7, %v1640_v7 }
 0x7af   :  { %2335 = vmatmul.mubr.bf16.vlgmr.msra.gmra.mrb[80].mxu1 %v1641_v8 }
 0x882   :  { %v1741_v42 = vpop.f32.mrb[80].mxu1 }
 0x883   :  { %v1742_v43 = vadd.f32 %v1741_v42, %v1658_v38  ;;  %v2336_v44 = vpop.f32.mrb[81].mxu1 }
 0x884   :  { %v1744_v16 = vpop.f32.mrb[82].mxu1 }
 0x885   :  { %v2337_v46 = vpop.f32.mrb[83].mxu1  ;;  %v1750_v21 = vsel %vm1749_vm1, %v1742_v43, -1e+30 }
 0x886   :  { %1751 = vmax.xlane.f32.xlu1 %v1750_v21 }
 0x913   :  { %v1752_v48 = vpop.xlane.xlu1 %1751 }
 0x914   :  { %v1753_v9 = vsub.f32 %v1750_v21, %v1752_v48 }
 0x916   :  { %v1754_v50 = vmul.f32 1.442695, %v1753_v9 }
 0x918   :  { %2423 = vpow2.f32 %v1754_v50 }
 0x922   :  { %v2424_v17 = vpop.eup %2423 }
 0x923   :  { %1756 = vadd.xlane.f32.xlu0 %v2424_v17 }
 0x9b0   :  { %v1757_v19 = vpop.xlane.xlu0 %1756 }
 0x9b1   :  { %2425 = vlog2.f32 %v1757_v19 }
 0x9bb   :  { %v2426_v51 = vpop.eup %2425 }
 0x9bc   :  { %v1759_v55 = vmul.f32 0.6931472, %v2426_v51 }
 0x9be   :  { %v1760_v24 = vsub.f32 %v1753_v9, %v1759_v55 }
 0x9c0   :  { %1761 = vst [vmem:[%s3132_s11] sm:$0xff] %v1760_v24 }

</bundles_post_ra>
